<compile_context>
chip_gen: v7x
topology: tpu7x:2x2x1
jax: 0.10.0
libtpu: 0.0.40
codegen_flags: <defaults>
</compile_context>

<pallas_src>
import math

import jax
import jax.numpy as jnp
from jax.experimental import pallas as pl
from jax.experimental.pallas import tpu as pltpu


_SMALL_TOTAL = 4096          # below this, fused XLA elementwise beats pallas dispatch
_BLOCK_BYTES = 2 << 20       # 2 MiB/buffer: v5e scoped-VMEM safe, near roofline v6e/v7x


def _softplus(x, beta=1.0):
    # stable equivalent of F.softplus(x, beta) = (1/beta) * log(1 + exp(beta*x))
    return jax.nn.softplus(beta * x) / beta


def _round_up(x, m):
    return (x + m - 1) // m * m


def _cdiv(a, b):
    return (a + b - 1) // b


def _stable_scores(d, sigma, p, neg_s, neg_alpha, inv_denom):
    # k1*k2 fused into a single exp in log-space; softplus in stable form.
    z = p - d
    sp = jnp.maximum(z, 0.0) + jnp.log1p(jnp.exp(-jnp.abs(z)))
    log_k2 = jnp.log1p(d * d * inv_denom)
    return sigma * jnp.exp(neg_s * sp + neg_alpha * log_k2)


def sigmoid_gated_kernel_body(params_ref, d_ref, o_ref):
    # params_ref: SMEM (5,) f32 = [sigma, p, -s, -alpha, 1/(2*alpha*lengthscale^2)]
    sigma = params_ref[0]
    p = params_ref[1]
    neg_s = params_ref[2]
    neg_alpha = params_ref[3]
    inv_denom = params_ref[4]
    o_ref[...] = _stable_scores(d_ref[...], sigma, p, neg_s, neg_alpha, inv_denom)


def _prep_params(raw_params):
    # softplus with the module's per-parameter betas, then fold all scalar
    # algebra so the kernel only does mul/add + 4 transcendentals per element.
    lengthscale = _softplus(raw_params["lengthscale"], beta=0.4)
    sigma = _softplus(raw_params["sigma"], beta=1.0)
    s = _softplus(raw_params["s"], beta=0.3)
    alpha = _softplus(raw_params["alpha"], beta=1.0)
    p = _softplus(raw_params["p"], beta=1.0)
    inv_denom = 1.0 / (2.0 * alpha * lengthscale * lengthscale)
    return jnp.concatenate([sigma, p, -s, -alpha, inv_denom]).astype(jnp.float32)


def _choose_layout(shape):
    """Pick a copy-free (rows, lanes, block_rows) 2-D view of the flat tensor.
    Returns None if there is no good Pallas layout (fall back to plain jnp)."""
    total = math.prod(shape) if shape else 1

    lanes = None
    for cand in (1024, 512, 256, 128):          # lane-dense, unmasked stores
        if total % cand == 0:
            lanes = cand
            break
    if lanes is None:
        # ragged total: use the original trailing dim as the lane dim.
        # A block dim equal to the full array dim is exempt from the (8,128)
        # rule; the last partial row-block is masked by Pallas (no jnp.pad,
        # no output slice).
        lanes = shape[-1] if len(shape) >= 1 else total
        if lanes <= 0 or total % lanes != 0:
            return None
        if lanes * 8 * 4 > 4 * _BLOCK_BYTES:
            return None                          # pathological unaligned trailing dim

    rows = total // lanes
    if rows < 8:
        block_rows = rows                        # full-dim block (exempt from sublane rule)
    else:
        budget_rows = max(8, (_BLOCK_BYTES // (lanes * 4)) // 8 * 8)
        # keep >= 2 grid steps so both v7x TensorCores get work
        block_rows = min(budget_rows, max(8, _round_up(_cdiv(rows, 2), 8)))
    return rows, lanes, block_rows


def sigmoid_gated_scores(time_diff, raw_params):
    """time_diff: arbitrary-shape tensor of time differences.
    raw_params: dict of the 5 raw scalar parameters (each shape (1,))."""
    orig_shape = time_diff.shape
    d = time_diff.astype(jnp.float32)
    params = _prep_params(raw_params)            # (5,) f32

    total = math.prod(orig_shape) if orig_shape else 1
    layout = _choose_layout(orig_shape) if total >= _SMALL_TOTAL else None

    if layout is None:
        # tiny / awkward shapes: one fused XLA elementwise op, no pallas overhead.
        sigma, p, neg_s, neg_alpha, inv_denom = (params[i] for i in range(5))
        return _stable_scores(d, sigma, p, neg_s, neg_alpha, inv_denom).reshape(orig_shape)

    rows, lanes, block_rows = layout
    x2d = d.reshape(rows, lanes)                 # metadata-only reshape, no HBM copy
    grid = (_cdiv(rows, block_rows),)            # last block may be partial (masked)

    out2d = pl.pallas_call(
        sigmoid_gated_kernel_body,
        out_shape=jax.ShapeDtypeStruct((rows, lanes), jnp.float32),
        grid=grid,
        in_specs=[
            pl.BlockSpec(memory_space=pltpu.SMEM),               # scalar params
            pl.BlockSpec((block_rows, lanes), lambda i: (i, 0)),  # lane-dense input tile
        ],
        out_specs=pl.BlockSpec((block_rows, lanes), lambda i: (i, 0)),
        compiler_params=pltpu.CompilerParams(
            dimension_semantics=("parallel",),
        ),
    )(params, x2d)

    return out2d.reshape(orig_shape)             # metadata-only reshape, no copy


def _reference(time_diff, raw_params):
    # original (pow-based) formulation for validation
    lengthscale = _softplus(raw_params["lengthscale"], beta=0.4)
    sigma = _softplus(raw_params["sigma"], beta=1.0)
    s = _softplus(raw_params["s"], beta=0.3)
    alpha = _softplus(raw_params["alpha"], beta=1.0)
    p = _softplus(raw_params["p"], beta=1.0)
    d = time_diff.astype(jnp.float32)
    k1 = (1.0 + jnp.exp(p - d)) ** (-s)
    k2 = (1.0 + d ** 2 / (2.0 * alpha * lengthscale ** 2)) ** (-alpha)
    return sigma * k1 * k2


if __name__ == "__main__":
    key = jax.random.PRNGKey(0)
    k_d, k_l, k_sg, k_a, k_s, k_p = jax.random.split(key, 6)

    # deterministic "randn" parameter init, shapes (1,) as in the module
    raw_params = {
        "lengthscale": jax.random.normal(k_l, (1,), jnp.float32),
        "sigma":       jax.random.normal(k_sg, (1,), jnp.float32),
        "alpha":       jax.random.normal(k_a, (1,), jnp.float32),
        "s":           jax.random.normal(k_s, (1,), jnp.float32),
        "p":           jax.random.normal(k_p, (1,), jnp.float32),
    }

    test_shapes = [
        (2, 8, 8),      # module-like tiny case -> fused-jnp fast path
        (4, 96, 128),   # 49152 elems, lane-aligned -> Pallas path (lanes=1024, grid=2)
        (3, 50, 70),    # 10500 elems, ragged      -> Pallas path (lanes=70, partial block)
    ]

    ok = True
    for idx, shape in enumerate(test_shapes):
        kd = jax.random.fold_in(k_d, idx)
        time_diff = jnp.abs(jax.random.normal(kd, shape, jnp.float32)) * 2.0

        out = sigmoid_gated_scores(time_diff, raw_params)
        out = jax.block_until_ready(out)

        ref = _reference(time_diff, raw_params)
        assert out.shape == shape
        if not jnp.allclose(out, ref, atol=1e-5, rtol=1e-4):
            ok = False
            print(f"MISMATCH at shape {shape}: "
                  f"max abs err {float(jnp.max(jnp.abs(out - ref)))}")

    assert ok, "mismatch vs reference"
    print("KERNEL_OK")
</pallas_src>

<mosaic_0001>
module attributes {stable_mosaic.version = 11 : i64} {
  func.func @sigmoid_gated_kernel_body(%arg0: i32, %arg1: memref<5xf32, #tpu.memory_space<smem>>, %arg2: memref<24x1024xf32, #tpu.memory_space<vmem>>, %arg3: memref<24x1024xf32, #tpu.memory_space<vmem>>) attributes {dimension_semantics = [#tpu.dimension_semantics<parallel>], iteration_bounds = array<i64: 2>, scalar_prefetch = 0 : i64, scratch_operands = 0 : i64, tpu.core_type = #tpu.core_type<tc>, window_params = [{transform_indices = @transform_0, window_bounds = array<i64: 5>}, {transform_indices = @transform_1, window_bounds = array<i64: 24, 1024>}, {transform_indices = @transform_2, window_bounds = array<i64: 24, 1024>}]} {
    %c0 = arith.constant 0 : index
    %0 = memref.load %arg1[%c0] : memref<5xf32, #tpu.memory_space<smem>>
    %c1 = arith.constant 1 : index
    %1 = memref.load %arg1[%c1] : memref<5xf32, #tpu.memory_space<smem>>
    %c2 = arith.constant 2 : index
    %2 = memref.load %arg1[%c2] : memref<5xf32, #tpu.memory_space<smem>>
    %c3 = arith.constant 3 : index
    %3 = memref.load %arg1[%c3] : memref<5xf32, #tpu.memory_space<smem>>
    %c4 = arith.constant 4 : index
    %4 = memref.load %arg1[%c4] : memref<5xf32, #tpu.memory_space<smem>>
    %c0_0 = arith.constant 0 : index
    %c0_1 = arith.constant 0 : index
    %5 = vector.load %arg2[%c0_0, %c0_1] : memref<24x1024xf32, #tpu.memory_space<vmem>>, vector<24x1024xf32>
    %6 = vector.broadcast %1 : f32 to vector<24x1024xf32>
    %7 = arith.subf %6, %5 : vector<24x1024xf32>
    %cst = arith.constant 0.000000e+00 : f32
    %8 = vector.broadcast %cst : f32 to vector<24x1024xf32>
    %9 = arith.maximumf %7, %8 : vector<24x1024xf32>
    %10 = math.absf %7 : vector<24x1024xf32>
    %cst_2 = arith.constant 0.000000e+00 : f32
    %11 = vector.broadcast %cst_2 : f32 to vector<24x1024xf32>
    %12 = arith.subf %11, %10 : vector<24x1024xf32>
    %13 = math.exp %12 : vector<24x1024xf32>
    %14 = math.log1p %13 : vector<24x1024xf32>
    %15 = arith.addf %9, %14 : vector<24x1024xf32>
    %16 = arith.mulf %5, %5 : vector<24x1024xf32>
    %17 = vector.broadcast %4 : f32 to vector<24x1024xf32>
    %18 = arith.mulf %16, %17 : vector<24x1024xf32>
    %19 = math.log1p %18 : vector<24x1024xf32>
    %20 = vector.broadcast %2 : f32 to vector<24x1024xf32>
    %21 = arith.mulf %20, %15 : vector<24x1024xf32>
    %22 = vector.broadcast %3 : f32 to vector<24x1024xf32>
    %23 = arith.mulf %22, %19 : vector<24x1024xf32>
    %24 = arith.addf %21, %23 : vector<24x1024xf32>
    %25 = math.exp %24 : vector<24x1024xf32>
    %26 = vector.broadcast %0 : f32 to vector<24x1024xf32>
    %27 = arith.mulf %26, %25 : vector<24x1024xf32>
    %c0_3 = arith.constant 0 : index
    %c0_4 = arith.constant 0 : index
    %28 = vector.load %arg3[%c0_3, %c0_4] : memref<24x1024xf32, #tpu.memory_space<vmem>>, vector<24x1024xf32>
    tpu.vector_store %arg3[%c0_3, %c0_4], %27 {strides = array<i32>} : memref<24x1024xf32, #tpu.memory_space<vmem>>, vector<24x1024xf32>,
    return
  }
  func.func @transform_0(%arg0: i32) -> i32 {
    %c0_i32 = arith.constant 0 : i32
    %c0_i32_0 = arith.constant 0 : i32
    return %c0_i32 : i32
  }
  func.func @transform_1(%arg0: i32) -> (i32, i32) {
    %c0_i32 = arith.constant 0 : i32
    %c0_i32_0 = arith.constant 0 : i32
    return %arg0, %c0_i32 : i32, i32
  }
  func.func @transform_2(%arg0: i32) -> (i32, i32) {
    %c0_i32 = arith.constant 0 : i32
    %c0_i32_0 = arith.constant 0 : i32
    return %arg0, %c0_i32 : i32, i32
  }
}

</mosaic_0001>

<bundles_post_ra>
// kernel: tpu_custom_call.1
= control target key start
LH: loop header
LB: loop body
LE: loop exit
PB: predicated region body
PF: predicated region fallthrough
CT: control target
= control target key end

     0   :  { %7 = vsyncpa [#allocation5], 0  ;;  %s2591_s0 = inlined_call_operand.hbm [shape: f32[5], index: 0, kind: input, shape index: {}]   ;;  %s2592_s1 = inlined_call_operand.hbm [shape: f32[48,1024], index: 1, kind: input, shape index: {}]   ;;  %s2593_s2 = inlined_call_operand.hbm [shape: f32[48,1024], index: 2, kind: output, shape index: {}]  }
   0x1   :  { %8 = vsyncpa [#allocation3], 0 }
   0x2   :  { %10 = vsyncpa [#allocation3 + $0x1], 0 }
   0x3   :  { %11 = vsyncpa [#allocation4], 0 }
   0x4   :  { %13 = vsyncpa [#allocation4 + $0x1], 0  ;;  %s1541_s9 = smov 0   ;;  %s1543_s10 = smov 0  }
   0x5   :  { %s1545_s11 = smov 0   ;;  %s1547_s12 = smov 0  }
   0x6 LB: > { %s1562_s13 = sadd.s32 4294967295, %s1517_s12   ;;  %s1127_s14 = sadd.s32 4294967294, %s1517_s12   ;;  %s1517_s12 = sphi %s1547_s12, %s2699_s12   ;;  %s1513_s11 = sphi %s1545_s11, %s2698_s11   ;;  %s1509_s10 = sphi %s1543_s10, %s2697_s10   ;;  %s1505_s9 = sphi %s1541_s9, %s2696_s9  }
   0x7   : > { %s1566_s15 = sadd.s32 1, %s1517_s12   ;;  %s47_s16 = sadd.s32 1, %s1513_s11 }
   0x8   : > { %s44_s17 = ssub.s32 %s1517_s12, %s1566_s15  ;;  %p54_p0 = scmp.ne.s32.totalorder %s1513_s11, %s1509_s10 }
   0x9   : > { %p45_p1 = scmp.eq.s32.totalorder %s44_s17, 0  ;;  %p55_p2 = scmp.eq.s32.totalorder %s1517_s12, 0 }
   0xa   : > { %p60_p3 = scmp.ne.s32.totalorder %s1509_s10, %s1505_s9  ;;  %p2594_p4 = scmp.eq.s32.totalorder %s1562_s13, 0 }
   0xb   : > { %s1578_s18 = scalar_select %p45_p1, %s1513_s11, %s47_s16  }
   0xc   : > { %p1580_p5 = por %p55_p2, %p54_p0  ;;  %p1586_p6 = por %p2594_p4, %p60_p3 }
   0xd   : > { %p84_p7 = scmp.eq.s32.totalorder %s1562_s13, 1  ;;  %p90_p8 = scmp.eq.s32.totalorder %s1127_s14, 1 }
   0xe   : > { %s2598_s20 = scalar_select %p1586_p6, 1, 0 }
   0xf   : > { %p1128_p9 = scmp.ge.s32.totalorder %s1517_s12, 1  ;;  %p97_p10 = scmp.lt.s32.totalorder %s1517_s12, 3 }
  0x10   : > { %p1593_p11 = por %p84_p7, %p54_p0  ;;  %p1597_p12 = por %p90_p8, %p60_p3 }
  0x11   : > { %p1601_p13 = pnand %p1128_p9, %p97_p10  ;;  %p1172_p4 = scmp.lt.s32.totalorder %s1517_s12, 2 }
  0x12   : > { %s2599_s21 = scalar_select %p1593_p11, 1, 0 }
  0x13   : > { %s2600_s22 = scalar_select %p1597_p12, 1, 0 }
  0x14   : > { %p1159_p2 = pneg %p1601_p13  ;;  %s119_s24 = sand.u32 1, %s1513_s11  }
  0x15   : > { %s1147_s25 = smul.u32 3072, %s1517_s12  ;;  %p2602_p6 = scmp.eq.s32.totalorder %s1562_s13, 0 }
  0x16   : > { %p1615_p7 = pnand %p1172_p4, %p1580_p5  ;;  %s1149_s27 = smul.u32 192, %s119_s24 }
  0x17   : > { %p1160_p0 = pnand %p1159_p2, %p2602_p6  ;;  %s1404_s30 = scalar_lea.hbm %s2591_s0, 16 }
  0x18   : > { %p1405_p3 = scmp.ne.s32.totalorder %s2591_s0, %s1404_s30  ;;  %p1411_p6 = scmp.lt.u32.totalorder %s1404_s30, %s2591_s0 }
  0x19   : > { %p1406_p8 = pneg %p1160_p0 }
  0x1b   : > { %p1407_p9 = pnand %p1406_p8, %p1405_p3 }
  0x1d   : > { %p1408_p10 = pneg %p1407_p9 }
  0x1f   : > { %p1413_p4 = pnand %p1411_p6, %p1408_p10 }
  0x21   : > { %1416 = shalt.err (!%p1413_p4)
}
  0x22   : > { %s1519_s7 = smov [#allocation2]   ;;  %s1634_s19 = scalar_lea.hbm %s2592_s1, %s1147_s25 }
  0x23   : > { %1162 = dma.hbm_to_smem (!%p1160_p0), %s2591_s0, 16, %s1519_s7, [#allocation5]  }
  0x24   : > { %s123_s28 = scalar_lea.vmem [#allocation6], %s1149_s27  ;;  %s1638_s30 = scalar_lea.sflag [#allocation3], %s119_s24 }
  0x25   : > { %s131_s29 = sshll.u32 %s123_s28, 4  ;;  %s1417_s3 = scalar_lea.hbm %s1634_s19, 3072  ;;  %s1636_s29 = int_to_ptr.vmem [resolvable:$true] %s131_s29 }
  0x26   : > { %p1418_p5 = scmp.ne.s32.totalorder %s1634_s19, %s1417_s3  ;;  %p1419_p2 = pneg %p1615_p7 }
  0x27   : > { %s1422_s5 = scalar_lea.hbm %s2592_s1, 6144  ;;  %p1423_p8 = scmp.lt.u32.totalorder %s1634_s19, %s2592_s1 }
  0x28   : > { %p1420_p0 = pnand %p1419_p2, %p1418_p5  ;;  %p1424_p9 = scmp.lt.u32.totalorder %s1422_s5, %s1417_s3 }
  0x29   : > { %p1426_p6 = scmp.lt.u32.totalorder %s1417_s3, %s1634_s19 }
  0x2a   : > { %p1421_p3 = pneg %p1420_p0  ;;  %p1425_p10 = por %p1424_p9, %p1423_p8 }
  0x2c   : > { %p1427_p4 = por %p1426_p6, %p1425_p10 }
  0x2e   : > { %p1428_p1 = pnand %p1427_p4, %p1421_p3 }
  0x30   : > { %1431 = shalt.err (!%p1428_p1)
}
  0x31   : > { %s1432_s24 = scalar_lea.vmem %s1636_s29, 3072  ;;  %s1520_s27 = smov [#allocation6]  }
  0x32   : > { %p1433_p5 = scmp.ne.s32.totalorder %s1636_s29, %s1432_s24  ;;  %s1437_s8 = sshll.u32 %s1520_s27, 4  ;;  %s1438_s8 = int_to_ptr.vmem [resolvable:$false] %s1437_s8 }
  0x33   : > { %s1439_s14 = scalar_lea.vmem %s1438_s8, 6144  ;;  %p1440_p11 = scmp.lt.s32.totalorder %s1636_s29, %s1438_s8 }
  0x34   : > { %p1435_p0 = pnand %p1433_p5, %p1419_p2  ;;  %p1441_p8 = scmp.lt.s32.totalorder %s1439_s14, %s1432_s24 }
  0x36   : > { %p1436_p12 = pneg %p1435_p0  ;;  %p1442_p9 = por %p1441_p8, %p1440_p11 }
  0x38   : > { %p1443_p10 = pnand %p1442_p9, %p1436_p12 }
  0x3a   : > { %1446 = shalt.err (!%p1443_p10)
}
  0x3b   : > { %s1521_s16 = smov 1024   ;;  %s1522_s17 = smov 64  }
  0x3c   : > { %1166 = dma.hbm_to_vmem [thread:$0]  (!%p1615_p7), %s1634_s19, 3072, %s1636_s29, %s1638_s30, %s1521_s16, %s1521_s16, %s1522_s17  }
  0x3d   : > { %143 = sbr.rel (%p1601_p13) target bundleno = 327 (0x147), region = 28  ;;  %p2604_p1 = scmp.eq.s32.totalorder (!%p1601_p13), %s1562_s13, 0 }
  0x44   : > { %1492 = dma.done.wait (%p2604_p1), [#allocation5], 16   ;;  %p2605_p2 = pmov %p2604_p1 }
  0x45   : > { %s1673_s28 = sand.u32 1, %s1509_s10   ;;  %p2606_p11 = scmp.ne.s32.totalorder %s2598_s20, 0 }
  0x46   : > { %1494 = vsyncadd (%p2605_p2), [#allocation5], 4294967280  ;;  %s1150_s3 = smul.u32 192, %s1673_s28  ;;  %s150_s25 = scalar_lea.sflag [#allocation3], %s1673_s28 }
  0x48   : > { %s1679_s26 = scalar_lea.vmem [#allocation6], %s1150_s3 }
  0x49   : > { %1496 = dma.done.wait (%p2606_p11), %s150_s25, 3072  }
  0x4a   : > { %1498 = vsyncadd (%p2606_p11), %s150_s25, 4294964224 }
  0x4b   : > { %158 = sfence }
  0x4c   : > { %s1135_s23 = sld [smem:[#allocation2 + $0x1]]  ;;  %s1138_s19 = sld [smem:[#allocation2 + $0x4]]  ;;  %v182_v0 = vld [vmem:[%s1679_s26] sm:$0xff]  ;;  %v183_v1 = vld [vmem:[%s1679_s26 + $0x8] sm:$0xff]  ;;  %v184_v5 = vld [vmem:[%s1679_s26 + $0x10] sm:$0xff] }
  0x4d   : > { %v591_v2 = vmul.f32 %v182_v0, %v182_v0  ;;  %v592_v3 = vmul.f32 %v183_v1, %v183_v1  ;;  %s1687_s29 = sld [smem:[#allocation2]]  ;;  %s1689_s30 = sld [smem:[#allocation2 + $0x2]]  ;;  %v593_v9 = vmul.f32 %v184_v5, %v184_v5  ;;  %v185_v12 = vld [vmem:[%s1679_s26 + $0x18] sm:$0xff]  ;;  %v186_v13 = vld [vmem:[%s1679_s26 + $0x20] sm:$0xff]  ;;  %v187_v21 = vld [vmem:[%s1679_s26 + $0x28] sm:$0xff] }
  0x4e   : > { %s1710_s20 = sld [smem:[#allocation2 + $0x3]]  ;;  %v594_v16 = vmul.f32 %v185_v12, %v185_v12  ;;  %v595_v20 = vmul.f32 %v186_v13, %v186_v13  ;;  %v1723_v25 = vmul.f32 %v187_v21, %v187_v21  ;;  %v1726_v26 = vld [vmem:[%s1679_s26 + $0x30] sm:$0xff]  ;;  %v1729_v27 = vld [vmem:[%s1679_s26 + $0x38] sm:$0xff]  ;;  %v1732_v28 = vld [vmem:[%s1679_s26 + $0x40] sm:$0xff]  ;;  %s1967_s4 = scalar_lea.vmem [#allocation7], %s1150_s3 }
  0x4f   : > { %v1736_v29 = vmul.f32 %v1726_v26, %v1726_v26  ;;  %v1740_v30 = vmul.f32 %v1729_v27, %v1729_v27  ;;  %v1744_v31 = vmul.f32 %v1732_v28, %v1732_v28  ;;  %v1747_v32 = vld [vmem:[%s1679_s26 + $0x48] sm:$0xff]  ;;  %v1750_v33 = vld [vmem:[%s1679_s26 + $0x50] sm:$0xff]  ;;  %s1148_s5 = smul.u32 3072, %s1562_s13  ;;  %s1042_s6 = sshll.u32 %s1967_s4, 4  ;;  %s2545_s6 = int_to_ptr.vmem [resolvable:$true] %s1042_s6 }
  0x50   : > { %v1754_v36 = vmul.f32 %v1747_v32, %v1747_v32  ;;  %v1758_v37 = vmul.f32 %v1750_v33, %v1750_v33  ;;  %s1028_s8 = scalar_lea.sflag [#allocation4], %s1673_s28  ;;  %s1447_s14 = scalar_lea.vmem %s2545_s6, 3072 }
  0x51   : > { %s2543_s27 = scalar_lea.hbm %s2593_s2, %s1148_s5  ;;  %p1448_p12 = scmp.ne.s32.totalorder %s2545_s6, %s1447_s14 }
  0x52   : > { %v1691_v4 = vstv %s1135_s23  ;;  %v1697_v7 = vstv %s1138_s19  ;;  %p2693_p13 = scmp.ne.s32.totalorder %s2599_s21, 0  ;;  %s1523_s13 = smov [#allocation7]  }
  0x53   : > { %v1695_v6 = vsub.f32 %v1691_v4, %v182_v0  ;;  %v1700_v8 = vsub.f32 %v1691_v4, %v183_v1  ;;  %v1703_v10 = vmul.f32 %v1697_v7, %v591_v2  ;;  %v1706_v11 = vmul.f32 %v1697_v7, %v592_v3  ;;  %s1451_s16 = sshll.u32 %s1523_s13, 4  ;;  %s1452_s16 = int_to_ptr.vmem [resolvable:$false] %s1451_s16 }
  0x54   : > { %v1717_v19 = vsub.f32 %v1691_v4, %v184_v5  ;;  %v1721_v24 = vmul.f32 %v1697_v7, %v593_v9  ;;  %v1761_v38 = vstv %s1689_s30  ;;  %v1764_v39 = vstv %s1687_s29  ;;  %p1449_p7 = pnand %p1448_p12, %p2693_p13  ;;  %s1453_s17 = scalar_lea.vmem %s1452_s16, 6144 }
  0x55   : > { %v255_v14 = vand.u32 2147483647, %v1695_v6  ;;  %v256_v15 = vand.u32 2147483647, %v1700_v8  ;;  %v640_v17 = vadd.f32 1.0, %v1703_v10  ;;  %v649_v18 = vadd.f32 1.0, %v1706_v11  ;;  %p1454_p6 = scmp.lt.s32.totalorder %s2545_s6, %s1452_s16  ;;  %p1455_p4 = scmp.lt.s32.totalorder %s1453_s17, %s1447_s14 }
  0x56   : > { %v257_v40 = vand.u32 2147483647, %v1717_v19  ;;  %v643_v41 = vmul.f32 -0.5, %v1703_v10  ;;  %v652_v42 = vmul.f32 -0.5, %v1706_v11  ;;  %v658_v43 = vadd.f32 1.0, %v1721_v24  ;;  %p1450_p3 = pneg %p1449_p7 }
  0x57   : > { %v279_v22 = vsub.f32 0.0, %v255_v14  ;;  %v280_v23 = vsub.f32 0.0, %v256_v15  ;;  %1212 = vlog2.f32 %v640_v17  ;;  %v1771_v45 = vsub.f32 %v1691_v4, %v185_v12  ;;  %p1456_p5 = por %p1455_p4, %p1454_p6 }
  0x58   : > { %1214 = vlog2.f32 %v649_v18  ;;  %v281_v44 = vsub.f32 0.0, %v257_v40  ;;  %v1774_v46 = vmul.f32 %v1697_v7, %v594_v16  ;;  %v231_v47 = vmax.f32 %v1695_v6, 0.0 }
  0x59   : > { %v303_v34 = vmul.f32 1.442695, %v279_v22  ;;  %v305_v35 = vmul.f32 1.442695, %v280_v23  ;;  %v646_v48 = vand.u32 2147483647, %v1703_v10  ;;  %v1779_v49 = vstv %s1710_s20  ;;  %p1457_p0 = pnand %p1456_p5, %p1450_p3 }
  0x5a   : > { %v1782_v50 = vsub.f32 %v1691_v4, %v186_v13  ;;  %v307_v51 = vmul.f32 1.442695, %v281_v44  ;;  %v661_v52 = vmul.f32 -0.5, %v1721_v24  ;;  %v258_v53 = vand.u32 2147483647, %v1771_v45 }
  0x5b   : > { %1216 = vpow2.f32 %v303_v34  ;;  %v667_v54 = vadd.f32 1.0, %v1774_v46  ;;  %v644_v55 = vadd.f32 1.0, %v643_v41  ;;  %v653_v56 = vadd.f32 1.0, %v652_v42 }
  0x5c   : > { %1218 = vpow2.f32 %v305_v35  ;;  %v655_v57 = vand.u32 2147483647, %v1706_v11  ;;  %v282_v58 = vsub.f32 0.0, %v258_v53  ;;  %v259_v59 = vand.u32 2147483647, %v1782_v50 }
  0x5d   : > { %1220 = vlog2.f32 %v658_v43  ;;  %v1790_v60 = vmul.f32 %v1697_v7, %v595_v20  ;;  %vm1792_vm0 = vcmp.lt.f32.partialorder %v646_v48, 0.0004427343  ;;  %v232_v62 = vmax.f32 %v1700_v8, 0.0 }
  0x5e   : > { %1222 = vpow2.f32 %v307_v51  ;;  %v664_v63 = vand.u32 2147483647, %v1721_v24  ;;  %v662_v1 = vadd.f32 1.0, %v661_v52  ;;  %v309_v2 = vmul.f32 1.442695, %v282_v58 }
  0x5f   : > { %1224 = vlog2.f32 %v667_v54  ;;  %v283_v3 = vsub.f32 0.0, %v259_v59  ;;  %v1799_v5 = vsub.f32 %v1691_v4, %v187_v21  ;;  %v645_v9 = vmul.f32 %v644_v55, %v1703_v10 }
  0x60   : > { %vm1802_vm1 = vcmp.lt.f32.partialorder %v655_v57, 0.0004427343  ;;  %v233_v13 = vmax.f32 %v1717_v19, 0.0  ;;  %v676_v14 = vadd.f32 1.0, %v1790_v60  ;;  %v654_v16 = vmul.f32 %v653_v56, %v1706_v11 }
  0x61   : > { %v1213_v0 = vpop.eup %1212  ;;  %1226 = vpow2.f32 %v309_v2  ;;  %v670_v17 = vmul.f32 -0.5, %v1774_v46  ;;  %v673_v18 = vand.u32 2147483647, %v1774_v46  ;;  %vm1811_vm2 = vcmp.lt.f32.partialorder %v664_v63, 0.0004427343 }
  0x62   : > { %v1215_v15 = vpop.eup %1214  ;;  %v642_v21 = vmul.f32 0.6931472, %v1213_v0  ;;  %v234_v22 = vmax.f32 %v1771_v45, 0.0  ;;  %v679_v23 = vmul.f32 -0.5, %v1790_v60  ;;  %v663_v40 = vmul.f32 %v662_v1, %v1721_v24 }
  0x63   : > { %v311_v11 = vmul.f32 1.442695, %v283_v3  ;;  %v260_v41 = vand.u32 2147483647, %v1799_v5  ;;  %v651_v43 = vmul.f32 0.6931472, %v1215_v15  ;;  %1228 = vlog2.f32 %v676_v14 }
  0x64   : > { %v235_v44 = vmax.f32 %v1782_v50, 0.0  ;;  %v671_v51 = vadd.f32 1.0, %v670_v17  ;;  %vm1820_vm3 = vcmp.lt.f32.partialorder %v673_v18, 0.0004427343  ;;  %v680_v55 = vadd.f32 1.0, %v679_v23 }
  0x65   : > { %v1217_v20 = vpop.eup %1216  ;;  %v682_v24 = vand.u32 2147483647, %v1790_v60  ;;  %v648_v58 = vsel %vm1792_vm0, %v645_v9, %v642_v21  ;;  %v284_v59 = vsub.f32 0.0, %v260_v41  ;;  %v657_v1 = vsel %vm1802_vm1, %v654_v16, %v651_v43 }
  0x66   : > { %v1219_v34 = vpop.eup %1218  ;;  %v351_v35 = vadd.f32 1.0, %v1217_v20  ;;  %v354_v48 = vmul.f32 -0.5, %v1217_v20  ;;  %v357_v57 = vand.u32 2147483647, %v1217_v20  ;;  %v1831_v18 = vmul.f32 %v1697_v7, %v1723_v25 }
  0x67   : > { %v360_v42 = vadd.f32 1.0, %v1219_v34  ;;  %v1221_v53 = vpop.eup %1220  ;;  %v363_v54 = vmul.f32 -0.5, %v1219_v34  ;;  %v366_v0 = vand.u32 2147483647, %v1219_v34  ;;  %v313_v17 = vmul.f32 1.442695, %v284_v59 }
  0x68   : > { %1230 = vlog2.f32 %v351_v35  ;;  %v1223_v56 = vpop.eup %1222  ;;  %v355_v14 = vadd.f32 1.0, %v354_v48  ;;  %v660_v15 = vmul.f32 0.6931472, %v1221_v53  ;;  %v672_v9 = vmul.f32 %v671_v51, %v1774_v46 }
  0x69   : > { %1232 = vlog2.f32 %v360_v42  ;;  %v1225_v63 = vpop.eup %1224  ;;  %v369_v2 = vadd.f32 1.0, %v1223_v56  ;;  %v372_v3 = vmul.f32 -0.5, %v1223_v56  ;;  %v364_v23 = vadd.f32 1.0, %v363_v54 }
  0x6a   : > { %1234 = vpow2.f32 %v311_v11  ;;  %v669_v61 = vmul.f32 0.6931472, %v1225_v63  ;;  %v882_v35 = vmul.f32 %v1779_v49, %v648_v58  ;;  %v375_v11 = vand.u32 2147483647, %v1223_v56 }
  0x6b   : > { %1236 = vlog2.f32 %v369_v2  ;;  %v1227_v21 = vpop.eup %1226  ;;  %vm1835_vm4 = vcmp.lt.f32.partialorder %v682_v24, 0.0004427343  ;;  %v685_v16 = vadd.f32 1.0, %v1831_v18  ;;  %vm1840_vm5 = vcmp.lt.f32.partialorder %v357_v57, 0.0004427343 }
  0x6c   : > { %1238 = vpow2.f32 %v313_v17  ;;  %v883_v25 = vmul.f32 %v1779_v49, %v657_v1  ;;  %v373_v42 = vadd.f32 1.0, %v372_v3  ;;  %v378_v43 = vadd.f32 1.0, %v1227_v21 }
  0x6d   : > { %v356_v46 = vmul.f32 %v1217_v20, %v355_v14  ;;  %vm1845_vm6 = vcmp.lt.f32.partialorder %v366_v0, 0.0004427343  ;;  %v666_v51 = vsel %vm1811_vm2, %v663_v40, %v660_v15  ;;  %v1852_v53 = vmul.f32 %v680_v55, %v1790_v60  ;;  %v1229_v54 = vpop.eup %1228 }
  0x6e   : > { %v365_v24 = vmul.f32 %v1219_v34, %v364_v23  ;;  %1240 = vlog2.f32 %v378_v43  ;;  %v675_v57 = vsel %vm1820_vm3, %v672_v9, %v669_v61  ;;  %v688_v58 = vmul.f32 -0.5, %v1831_v18 }
  0x6f   : > { %vm1857_vm7 = vcmp.lt.f32.partialorder %v375_v11, 0.0004427343  ;;  %v381_v63 = vmul.f32 -0.5, %v1227_v21  ;;  %1242 = vlog2.f32 %v685_v16  ;;  %v1863_v10 = vsub.f32 %v1691_v4, %v1726_v26 }
  0x70   : > { %v374_v34 = vmul.f32 %v1223_v56, %v373_v42  ;;  %v884_v55 = vmul.f32 %v1779_v49, %v666_v51  ;;  %v384_v52 = vand.u32 2147483647, %v1227_v21  ;;  %v1867_v2 = vmul.f32 %v1779_v49, %v675_v57 }
  0x71   : > { %v1869_v3 = vmul.f32 0.6931472, %v1229_v54  ;;  %v261_v14 = vand.u32 2147483647, %v1863_v10  ;;  %v689_v17 = vadd.f32 1.0, %v688_v58  ;;  %v1876_v56 = vmul.f32 %v1697_v7, %v1736_v29 }
  0x72   : > { %v1231_v59 = vpop.eup %1230  ;;  %v382_v9 = vadd.f32 1.0, %v381_v63  ;;  %vm1884_vm8 = vcmp.lt.f32.partialorder %v384_v52, 0.0004427343  ;;  %v691_v29 = vand.u32 2147483647, %v1831_v18  ;;  %v1950_v50 = vsub.f32 %v1691_v4, %v1732_v28 }
  0x73   : > { %v1233_v60 = vpop.eup %1232  ;;  %v353_v40 = vmul.f32 0.6931472, %v1231_v59  ;;  %v285_v11 = vsub.f32 0.0, %v261_v14  ;;  %v684_v8 = vsel %vm1835_vm4, %v1852_v53, %v1869_v3  ;;  %v694_v54 = vadd.f32 1.0, %v1876_v56 }
  0x74   : > { %v1235_v0 = vpop.eup %1234  ;;  %v362_v1 = vmul.f32 0.6931472, %v1233_v60  ;;  %v383_v58 = vmul.f32 %v1227_v21, %v382_v9  ;;  %v1903_v21 = vsub.f32 %v1691_v4, %v1729_v27  ;;  %vm1911_vm9 = vcmp.lt.f32.partialorder %v691_v29, 0.0004427343 }
  0x75   : > { %v359_v15 = vsel %vm1840_vm5, %v356_v46, %v353_v40  ;;  %v387_v26 = vadd.f32 1.0, %v1235_v0  ;;  %v1237_v16 = vpop.eup %1236  ;;  %v390_v46 = vmul.f32 -0.5, %v1235_v0  ;;  %v315_v48 = vmul.f32 1.442695, %v285_v11 }
  0x76   : > { %v567_v23 = vadd.f32 %v359_v15, %v231_v47  ;;  %v368_v61 = vsel %vm1845_vm6, %v365_v24, %v362_v1  ;;  %v1239_v43 = vpop.eup %1238  ;;  %v371_v47 = vmul.f32 0.6931472, %v1237_v16  ;;  %v393_v40 = vand.u32 2147483647, %v1235_v0 }
  0x77   : > { %v568_v42 = vadd.f32 %v368_v61, %v232_v62  ;;  %1244 = vlog2.f32 %v387_v26  ;;  %v396_v62 = vadd.f32 1.0, %v1239_v43  ;;  %v391_v53 = vadd.f32 1.0, %v390_v46 }
  0x78   : > { %v857_v6 = vmul.f32 %v1761_v38, %v567_v23  ;;  %v377_v57 = vsel %vm1857_vm7, %v374_v34, %v371_v47  ;;  %1246 = vpow2.f32 %v315_v48  ;;  %v1241_v59 = vpop.eup %1240  ;;  %v399_v3 = vmul.f32 -0.5, %v1239_v43 }
  0x79   : > { %v858_v51 = vmul.f32 %v1761_v38, %v568_v42  ;;  %v569_v60 = vadd.f32 %v377_v57, %v233_v13  ;;  %1248 = vlog2.f32 %v396_v62  ;;  %v1243_v52 = vpop.eup %1242  ;;  %v380_v12 = vmul.f32 0.6931472, %v1241_v59 }
  0x7a   : > { %v906_v24 = vadd.f32 %v882_v35, %v857_v6  ;;  %1250 = vlog2.f32 %v694_v54  ;;  %v690_v13 = vmul.f32 %v689_v17, %v1831_v18  ;;  %v687_v15 = vmul.f32 0.6931472, %v1243_v52 }
  0x7b   : > { %v907_v63 = vadd.f32 %v883_v25, %v858_v51  ;;  %v859_v35 = vmul.f32 %v1761_v38, %v569_v60  ;;  %v386_v19 = vsel %vm1884_vm8, %v383_v58, %v380_v12  ;;  %v697_v25 = vmul.f32 -0.5, %v1876_v56 }
  0x7c   : > { %v930_v1 = vmul.f32 1.442695, %v906_v24  ;;  %v570_v34 = vadd.f32 %v386_v19, %v234_v22  ;;  %v392_v26 = vmul.f32 %v1235_v0, %v391_v53  ;;  %v400_v23 = vadd.f32 1.0, %v399_v3 }
  0x7d   : > { %v932_v14 = vmul.f32 1.442695, %v907_v63  ;;  %v908_v20 = vadd.f32 %v884_v55, %v859_v35  ;;  %v402_v61 = vand.u32 2147483647, %v1239_v43  ;;  %vm1916_vm10 = vcmp.lt.f32.partialorder %v393_v40, 0.0004427343 }
  0x7e   : > { %1252 = vpow2.f32 %v930_v1  ;;  %v860_v16 = vmul.f32 %v1761_v38, %v570_v34  ;;  %v262_v55 = vand.u32 2147483647, %v1903_v21  ;;  %v236_v22 = vmax.f32 %v1799_v5, 0.0 }
  0x7f   : > { %1254 = vpow2.f32 %v932_v14  ;;  %v934_v11 = vmul.f32 1.442695, %v908_v20  ;;  %v698_v0 = vadd.f32 1.0, %v697_v25  ;;  %v1924_v17 = vmul.f32 %v1697_v7, %v1740_v30 }
  0x80   : > { %v909_v42 = vadd.f32 %v1867_v2, %v860_v16  ;;  %v693_v41 = vsel %vm1911_vm9, %v690_v13, %v687_v15  ;;  %v286_v29 = vsub.f32 0.0, %v262_v55  ;;  %v886_v46 = vmul.f32 %v1779_v49, %v684_v8  ;;  %v1991_v16 = vld [vmem:[%s1679_s26 + $0x68] sm:$0xff] }
  0x81   : > { %v1245_v9 = vpop.eup %1244  ;;  %1256 = vpow2.f32 %v934_v11  ;;  %v401_v5 = vmul.f32 %v1239_v43, %v400_v23  ;;  %vm1934_vm11 = vcmp.lt.f32.partialorder %v402_v61, 0.0004427343  ;;  %v703_v54 = vadd.f32 1.0, %v1924_v17  ;;  %v1988_v11 = vld [vmem:[%s1679_s26 + $0x60] sm:$0xff] }
  0x82   : > { %v389_v45 = vmul.f32 0.6931472, %v1245_v9  ;;  %v1929_v6 = vpop.eup %1246  ;;  %v936_v51 = vmul.f32 1.442695, %v909_v42  ;;  %v887_v57 = vmul.f32 %v1779_v49, %v693_v41  ;;  %v700_v58 = vand.u32 2147483647, %v1876_v56 }
  0x83   : > { %v1249_v30 = vpop.eup %1248  ;;  %v405_v62 = vadd.f32 1.0, %v1929_v6  ;;  %v317_v8 = vmul.f32 1.442695, %v286_v29  ;;  %v1946_v63 = vmul.f32 %v698_v0, %v1876_v56  ;;  %v408_v40 = vmul.f32 -0.5, %v1929_v6  ;;  %v1985_v9 = vld [vmem:[%s1679_s26 + $0x58] sm:$0xff] }
  0x84   : > { %v395_v47 = vsel %vm1916_vm10, %v392_v26, %v389_v45  ;;  %v398_v24 = vmul.f32 0.6931472, %v1249_v30  ;;  %v1251_v43 = vpop.eup %1250  ;;  %1258 = vpow2.f32 %v936_v51  ;;  %v1957_v52 = vmul.f32 %v1697_v7, %v1744_v31 }
  0x85   : > { %v571_v2 = vadd.f32 %v395_v47, %v235_v44  ;;  %1260 = vlog2.f32 %v405_v62  ;;  %v696_v3 = vmul.f32 0.6931472, %v1251_v43  ;;  %vm1961_vm12 = vcmp.lt.f32.partialorder %v700_v58, 0.0004427343 }
  0x86   : > { %v404_v60 = vsel %vm1934_vm11, %v401_v5, %v398_v24  ;;  %1262 = vlog2.f32 %v703_v54  ;;  %v706_v19 = vmul.f32 -0.5, %v1924_v17  ;;  %v263_v13 = vand.u32 2147483647, %v1950_v50  ;;  %v2025_v54 = vld [vmem:[%s1679_s26 + $0x70] sm:$0xff]  ;;  %v2028_v24 = vld [vmem:[%s1679_s26 + $0x78] sm:$0xff] }
  0x87   : > { %v861_v59 = vmul.f32 %v1761_v38, %v571_v2  ;;  %v572_v53 = vadd.f32 %v404_v60, %v236_v22  ;;  %1264 = vpow2.f32 %v317_v8  ;;  %v409_v25 = vadd.f32 1.0, %v408_v40 }
  0x88   : > { %v1253_v44 = vpop.eup %1252  ;;  %v411_v20 = vand.u32 2147483647, %v1929_v6  ;;  %v712_v34 = vadd.f32 1.0, %v1957_v52  ;;  %v1978_v15 = vsub.f32 %v1691_v4, %v1747_v32  ;;  %v287_v61 = vsub.f32 0.0, %v263_v13 }
  0x89   : > { %v1255_v1 = vpop.eup %1254  ;;  %v979_v56 = vmul.f32 %v1253_v44, %v1764_v39  ;;  %v910_v12 = vadd.f32 %v886_v46, %v861_v59  ;;  %v862_v35 = vmul.f32 %v1761_v38, %v572_v53  ;;  %v1982_v27 = vmul.f32 %v1697_v7, %v1754_v36 }
  0x8a   : > { %v980_v28 = vmul.f32 %v1255_v1, %v1764_v39  ;;  %v1996_v32 = vmul.f32 %v1985_v9, %v1985_v9  ;;  %v2000_v55 = vmul.f32 %v1988_v11, %v1988_v11  ;;  %v2004_v36 = vmul.f32 %v1991_v16, %v1991_v16 }
  0x8b   : > { %1003 = vst [vmem:[%s1967_s4] sm:$0xff] %v979_v56  ;;  %v938_v31 = vmul.f32 1.442695, %v910_v12  ;;  %v1257_v26 = vpop.eup %1256  ;;  %v911_v23 = vadd.f32 %v887_v57, %v862_v35  ;;  %v237_v22 = vmax.f32 %v1863_v10, 0.0  ;;  %v702_v0 = vsel %vm1961_vm12, %v1946_v63, %v696_v3 }
  0x8c   : > { %1004 = vst [vmem:[%s1967_s4 + $0x8] sm:$0xff] %v980_v28  ;;  %v981_v18 = vmul.f32 %v1257_v26, %v1764_v39  ;;  %v319_v42 = vmul.f32 1.442695, %v287_v61  ;;  %vm2011_vm13 = vcmp.lt.f32.partialorder %v411_v20, 0.0004427343  ;;  %v707_v29 = vadd.f32 1.0, %v706_v19 }
  0x8d   : > { %1266 = vpow2.f32 %v938_v31  ;;  %v940_v45 = vmul.f32 1.442695, %v911_v23  ;;  %v264_v47 = vand.u32 2147483647, %v1978_v15  ;;  %v410_v10 = vmul.f32 %v1929_v6, %v409_v25 }
  0x8e   : > { %1005 = vst [vmem:[%s1967_s4 + $0x10] sm:$0xff] %v981_v18  ;;  %1268 = vlog2.f32 %v712_v34  ;;  %v1259_v46 = vpop.eup %1258  ;;  %v709_v5 = vand.u32 2147483647, %v1924_v17  ;;  %v721_v48 = vadd.f32 1.0, %v1982_v27  ;;  %v2022_v62 = vsub.f32 %v1691_v4, %v1750_v33 }
  0x8f   : > { %1270 = vpow2.f32 %v940_v45  ;;  %v1261_v30 = vpop.eup %1260  ;;  %v982_v51 = vmul.f32 %v1259_v46, %v1764_v39  ;;  %v288_v2 = vsub.f32 0.0, %v264_v47  ;;  %v2032_v58 = vmul.f32 %v1697_v7, %v1758_v37 }
  0x90   : > { %1272 = vpow2.f32 %v319_v42  ;;  %v1263_v57 = vpop.eup %1262  ;;  %v407_v6 = vmul.f32 0.6931472, %v1261_v30  ;;  %v2036_v8 = vmul.f32 %v2025_v54, %v2025_v54  ;;  %v2040_v43 = vmul.f32 %v2028_v24, %v2028_v24 }
  0x91   : > { %v1265_v33 = vpop.eup %1264  ;;  %1006 = vst [vmem:[%s1967_s4 + $0x18] sm:$0xff] %v982_v51  ;;  %v888_v59 = vmul.f32 %v1779_v49, %v702_v0  ;;  %v708_v63 = vmul.f32 %v707_v29, %v1924_v17  ;;  %v715_v44 = vmul.f32 -0.5, %v1957_v52  ;;  %v321_v60 = vmul.f32 1.442695, %v288_v2 }
  0x92   : > { %v413_v37 = vsel %vm2011_vm13, %v410_v10, %v407_v6  ;;  %v414_v40 = vadd.f32 1.0, %v1265_v33  ;;  %v718_v1 = vand.u32 2147483647, %v1957_v52  ;;  %1274 = vlog2.f32 %v721_v48 }
  0x93   : > { %v573_v56 = vadd.f32 %v413_v37, %v237_v22  ;;  %vm2049_vm14 = vcmp.lt.f32.partialorder %v709_v5, 0.0004427343  ;;  %1276 = vpow2.f32 %v321_v60  ;;  %v265_v53 = vand.u32 2147483647, %v2022_v62 }
  0x94   : > { %1278 = vlog2.f32 %v414_v40  ;;  %v705_v28 = vmul.f32 0.6931472, %v1263_v57  ;;  %v724_v3 = vmul.f32 -0.5, %v1982_v27  ;;  %v730_v14 = vadd.f32 1.0, %v2032_v58 }
  0x95   : > { %v863_v35 = vmul.f32 %v1761_v38, %v573_v56  ;;  %v417_v19 = vmul.f32 -0.5, %v1265_v33  ;;  %v289_v13 = vsub.f32 0.0, %v265_v53  ;;  %v238_v25 = vmax.f32 %v1903_v21, 0.0 }
  0x96   : > { %v239_v20 = vmax.f32 %v1950_v50, 0.0  ;;  %v716_v34 = vadd.f32 1.0, %v715_v44  ;;  %vm2060_vm15 = vcmp.lt.f32.partialorder %v718_v1, 0.0004427343  ;;  %v727_v18 = vand.u32 2147483647, %v1982_v27 }
  0x97   : > { %v1267_v17 = vpop.eup %1266  ;;  %v912_v61 = vadd.f32 %v888_v59, %v863_v35  ;;  %v323_v45 = vmul.f32 1.442695, %v289_v13  ;;  %v2068_v22 = vsub.f32 %v1691_v4, %v1985_v9  ;;  %v420_v21 = vand.u32 2147483647, %v1265_v33 }
  0x98   : > { %v983_v31 = vmul.f32 %v1267_v17, %v1764_v39  ;;  %v1269_v23 = vpop.eup %1268  ;;  %v711_v42 = vsel %vm2049_vm14, %v708_v63, %v705_v28  ;;  %v725_v41 = vadd.f32 1.0, %v724_v3  ;;  %1280 = vlog2.f32 %v730_v14 }
  0x99   : > { %v1271_v0 = vpop.eup %1270  ;;  %v942_v46 = vmul.f32 1.442695, %v912_v61  ;;  %v418_v10 = vadd.f32 1.0, %v417_v19  ;;  %1282 = vpow2.f32 %v323_v45  ;;  %v714_v48 = vmul.f32 0.6931472, %v1269_v23 }
  0x9a   : > { %1007 = vst [vmem:[%s1967_s4 + $0x20] sm:$0xff] %v983_v31  ;;  %v1273_v29 = vpop.eup %1272  ;;  %v984_v47 = vmul.f32 %v1271_v0, %v1764_v39  ;;  %v717_v30 = vmul.f32 %v716_v34, %v1957_v52  ;;  %v733_v9 = vmul.f32 -0.5, %v2032_v58  ;;  %v240_v51 = vmax.f32 %v1978_v15, 0.0 }
  0x9b   : > { %v423_v5 = vadd.f32 1.0, %v1273_v29  ;;  %1284 = vpow2.f32 %v942_v46  ;;  %vm2077_vm0 = vcmp.lt.f32.partialorder %v727_v18, 0.0004427343  ;;  %v266_v57 = vand.u32 2147483647, %v2068_v22 }
  0x9c   : > { %1008 = vst [vmem:[%s1967_s4 + $0x28] sm:$0xff] %v984_v47  ;;  %v1275_v6 = vpop.eup %1274  ;;  %v889_v59 = vmul.f32 %v1779_v49, %v711_v42  ;;  %v726_v63 = vmul.f32 %v725_v41, %v1982_v27  ;;  %v2086_v52 = vmul.f32 %v1697_v7, %v1996_v32  ;;  %v419_v60 = vmul.f32 %v1265_v33, %v418_v10 }
  0x9d   : > { %1286 = vlog2.f32 %v423_v5  ;;  %v1277_v44 = vpop.eup %1276  ;;  %vm2088_vm1 = vcmp.lt.f32.partialorder %v420_v21, 0.0004427343  ;;  %v426_v40 = vmul.f32 -0.5, %v1273_v29  ;;  %v290_v1 = vsub.f32 0.0, %v266_v57 }
  0x9e   : > { %v1279_v56 = vpop.eup %1278  ;;  %v720_v12 = vsel %vm2060_vm15, %v717_v30, %v714_v48  ;;  %v432_v53 = vadd.f32 1.0, %v1277_v44  ;;  %v734_v17 = vadd.f32 1.0, %v733_v9  ;;  %v736_v27 = vand.u32 2147483647, %v2032_v58 }
  0x9f   : > { %v416_v28 = vmul.f32 0.6931472, %v1279_v56  ;;  %v429_v3 = vand.u32 2147483647, %v1273_v29  ;;  %v325_v32 = vmul.f32 1.442695, %v290_v1  ;;  %v2097_v33 = vsub.f32 %v1691_v4, %v1988_v11 }
  0xa0   : > { %1288 = vlog2.f32 %v432_v53  ;;  %v723_v14 = vmul.f32 0.6931472, %v1275_v6  ;;  %v241_v31 = vmax.f32 %v2022_v62, 0.0  ;;  %v739_v35 = vadd.f32 1.0, %v2086_v52 }
  0xa1   : > { %v422_v19 = vsel %vm2088_vm1, %v419_v60, %v416_v28  ;;  %v427_v13 = vadd.f32 1.0, %v426_v40  ;;  %v435_v34 = vmul.f32 -0.5, %v1277_v44  ;;  %1290 = vpow2.f32 %v325_v32 }
  0xa2   : > { %v1281_v26 = vpop.eup %1280  ;;  %v574_v23 = vadd.f32 %v422_v19, %v238_v25  ;;  %v890_v61 = vmul.f32 %v1779_v49, %v720_v12  ;;  %v735_v18 = vmul.f32 %v734_v17, %v2032_v58  ;;  %vm2105_vm2 = vcmp.lt.f32.partialorder %v736_v27, 0.0004427343 }
  0xa3   : > { %v1283_v45 = vpop.eup %1282  ;;  %vm2109_vm3 = vcmp.lt.f32.partialorder %v429_v3, 0.0004427343  ;;  %v242_v21 = vmax.f32 %v2068_v22, 0.0  ;;  %v742_v42 = vmul.f32 -0.5, %v2086_v52  ;;  %v267_v41 = vand.u32 2147483647, %v2097_v33 }
  0xa4   : > { %v864_v25 = vmul.f32 %v1761_v38, %v574_v23  ;;  %v729_v58 = vsel %vm2077_vm0, %v726_v63, %v723_v14  ;;  %v441_v47 = vadd.f32 1.0, %v1283_v45  ;;  %1292 = vlog2.f32 %v739_v35 }
  0xa5   : > { %v1285_v46 = vpop.eup %1284  ;;  %v428_v10 = vmul.f32 %v1273_v29, %v427_v13  ;;  %v436_v5 = vadd.f32 1.0, %v435_v34  ;;  %v438_v48 = vand.u32 2147483647, %v1277_v44  ;;  %v291_v30 = vsub.f32 0.0, %v267_v41 }
  0xa6   : > { %v985_v57 = vmul.f32 %v1285_v46, %v1764_v39  ;;  %v913_v6 = vadd.f32 %v889_v59, %v864_v25  ;;  %1294 = vlog2.f32 %v441_v47  ;;  %v732_v60 = vmul.f32 0.6931472, %v1281_v26 }
  0xa7   : > { %v1287_v9 = vpop.eup %1286  ;;  %v444_v40 = vmul.f32 -0.5, %v1283_v45  ;;  %v327_v1 = vmul.f32 1.442695, %v291_v30  ;;  %v2122_v2 = vsub.f32 %v1691_v4, %v1991_v16  ;;  %v891_v29 = vmul.f32 %v1779_v49, %v729_v58 }
  0xa8   : > { %v425_v37 = vmul.f32 0.6931472, %v1287_v9  ;;  %1009 = vst [vmem:[%s1967_s4 + $0x30] sm:$0xff] %v985_v57  ;;  %v944_v63 = vmul.f32 1.442695, %v913_v6  ;;  %v2129_v12 = vmul.f32 %v1697_v7, %v2000_v55  ;;  %v437_v53 = vmul.f32 %v1277_v44, %v436_v5 }
  0xa9   : > { %v745_v56 = vand.u32 2147483647, %v2086_v52  ;;  %v743_v17 = vadd.f32 1.0, %v742_v42  ;;  %1296 = vpow2.f32 %v327_v1  ;;  %vm2135_vm4 = vcmp.lt.f32.partialorder %v438_v48, 0.0004427343 }
  0xaa   : > { %v431_v59 = vsel %vm2109_vm3, %v428_v10, %v425_v37  ;;  %v1289_v27 = vpop.eup %1288  ;;  %1298 = vpow2.f32 %v944_v63  ;;  %v447_v3 = vand.u32 2147483647, %v1283_v45  ;;  %v445_v55 = vadd.f32 1.0, %v444_v40 }
  0xab   : > { %v575_v16 = vadd.f32 %v431_v59, %v239_v20  ;;  %v1291_v32 = vpop.eup %1290  ;;  %v434_v14 = vmul.f32 0.6931472, %v1289_v27  ;;  %v738_v35 = vsel %vm2105_vm2, %v735_v18, %v732_v60  ;;  %v268_v44 = vand.u32 2147483647, %v2122_v2 }
  0xac   : > { %v450_v13 = vadd.f32 1.0, %v1291_v32  ;;  %v748_v34 = vadd.f32 1.0, %v2129_v12  ;;  %v2146_v50 = vmul.f32 %v1697_v7, %v2004_v36  ;;  %v744_v26 = vmul.f32 %v743_v17, %v2086_v52 }
  0xad   : > { %v865_v19 = vmul.f32 %v1761_v38, %v575_v16  ;;  %v440_v20 = vsel %vm2135_vm4, %v437_v53, %v434_v14  ;;  %vm2151_vm5 = vcmp.lt.f32.partialorder %v745_v56, 0.0004427343  ;;  %v292_v18 = vsub.f32 0.0, %v268_v44 }
  0xae   : > { %v1293_v11 = vpop.eup %1292  ;;  %v576_v42 = vadd.f32 %v440_v20, %v240_v51  ;;  %v892_v41 = vmul.f32 %v1779_v49, %v738_v35  ;;  %1300 = vlog2.f32 %v450_v13  ;;  %v446_v36 = vmul.f32 %v1283_v45, %v445_v55 }
  0xaf   : > { %v914_v0 = vadd.f32 %v890_v61, %v865_v19  ;;  %vm2158_vm6 = vcmp.lt.f32.partialorder %v447_v3, 0.0004427343  ;;  %v453_v58 = vmul.f32 -0.5, %v1291_v32  ;;  %v329_v52 = vmul.f32 1.442695, %v292_v18 }
  0xb0   : > { %v1295_v47 = vpop.eup %1294  ;;  %v866_v10 = vmul.f32 %v1761_v38, %v576_v42  ;;  %1302 = vlog2.f32 %v748_v34  ;;  %v757_v61 = vadd.f32 1.0, %v2146_v50  ;;  %v751_v15 = vmul.f32 -0.5, %v2129_v12 }
  0xb1   : > { %v946_v46 = vmul.f32 1.442695, %v914_v0  ;;  %v443_v5 = vmul.f32 0.6931472, %v1295_v47  ;;  %1304 = vpow2.f32 %v329_v52  ;;  %v2167_v51 = vsub.f32 %v1691_v4, %v2025_v54 }
  0xb2   : > { %v915_v45 = vadd.f32 %v891_v29, %v866_v10  ;;  %v741_v48 = vmul.f32 0.6931472, %v1293_v11  ;;  %v754_v30 = vand.u32 2147483647, %v2129_v12  ;;  %v454_v6 = vadd.f32 1.0, %v453_v58 }
  0xb3   : > { %1306 = vpow2.f32 %v946_v46  ;;  %v2170_v9 = vpop.eup %1296  ;;  %v449_v57 = vsel %vm2158_vm6, %v446_v36, %v443_v5  ;;  %v456_v60 = vand.u32 2147483647, %v1291_v32  ;;  %v269_v37 = vand.u32 2147483647, %v2167_v51 }
  0xb4   : > { %v1299_v40 = vpop.eup %1298  ;;  %v948_v1 = vmul.f32 1.442695, %v915_v45  ;;  %v577_v54 = vadd.f32 %v449_v57, %v241_v31  ;;  %v459_v63 = vadd.f32 1.0, %v2170_v9  ;;  %1308 = vlog2.f32 %v757_v61  ;;  %v198_v61 = vld [vmem:[%s1679_s26 + $0x80] sm:$0xff] }
  0xb5   : > { %v986_v29 = vmul.f32 %v1299_v40, %v1764_v39  ;;  %v243_v56 = vmax.f32 %v2097_v33, 0.0  ;;  %v760_v59 = vmul.f32 -0.5, %v2146_v50  ;;  %v293_v53 = vsub.f32 0.0, %v269_v37 }
  0xb6   : > { %1310 = vpow2.f32 %v948_v1  ;;  %v867_v17 = vmul.f32 %v1761_v38, %v577_v54  ;;  %v747_v27 = vsel %vm2151_vm5, %v744_v26, %v741_v48  ;;  %v752_v16 = vadd.f32 1.0, %v751_v15 }
  0xb7   : > { %1010 = vst [vmem:[%s1967_s4 + $0x38] sm:$0xff] %v986_v29  ;;  %v455_v62 = vmul.f32 %v1291_v32, %v454_v6  ;;  %1312 = vlog2.f32 %v459_v63  ;;  %v331_v31 = vmul.f32 1.442695, %v293_v53  ;;  %v2187_v28 = vmul.f32 %v1697_v7, %v2036_v8 }
  0xb8   : > { %v1301_v3 = vpop.eup %1300  ;;  %v916_v14 = vadd.f32 %v892_v41, %v867_v17  ;;  %vm2189_vm7 = vcmp.lt.f32.partialorder %v456_v60, 0.0004427343  ;;  %v462_v35 = vmul.f32 -0.5, %v2170_v9  ;;  %vm2194_vm8 = vcmp.lt.f32.partialorder %v754_v30, 0.0004427343 }
  0xb9   : > { %v452_v19 = vmul.f32 0.6931472, %v1301_v3  ;;  %v761_v32 = vadd.f32 1.0, %v760_v59  ;;  %1314 = vpow2.f32 %v331_v31  ;;  %v2200_v13 = vsub.f32 %v1691_v4, %v2028_v24  ;;  %v199_v31 = vld [vmem:[%s1679_s26 + $0x88] sm:$0xff] }
  0xba   : > { %v1303_v8 = vpop.eup %1302  ;;  %v950_v34 = vmul.f32 1.442695, %v916_v14  ;;  %v893_v20 = vmul.f32 %v1779_v49, %v747_v27  ;;  %v244_v26 = vmax.f32 %v2122_v2, 0.0  ;;  %v763_v23 = vand.u32 2147483647, %v2146_v50 }
  0xbb   : > { %v2205_v18 = vpop.eup %1304  ;;  %v458_v11 = vsel %vm2189_vm7, %v455_v62, %v452_v19  ;;  %v465_v0 = vand.u32 2147483647, %v2170_v9  ;;  %v766_v42 = vadd.f32 1.0, %v2187_v28  ;;  %v270_v24 = vand.u32 2147483647, %v2200_v13 }
  0xbc   : > { %1316 = vpow2.f32 %v950_v34  ;;  %v578_v36 = vadd.f32 %v458_v11, %v242_v21  ;;  %v463_v25 = vadd.f32 1.0, %v462_v35  ;;  %v468_v58 = vadd.f32 1.0, %v2205_v18 }
  0xbd   : > { %v1307_v41 = vpop.eup %1306  ;;  %v750_v47 = vmul.f32 0.6931472, %v1303_v8  ;;  %v753_v46 = vmul.f32 %v752_v16, %v2129_v12  ;;  %v2218_v10 = vmul.f32 %v761_v32, %v2146_v50  ;;  %vm2222_vm9 = vcmp.lt.f32.partialorder %v763_v23, 0.0004427343 }
  0xbe   : > { %v987_v52 = vmul.f32 %v1307_v41, %v1764_v39  ;;  %v1309_v5 = vpop.eup %1308  ;;  %v868_v15 = vmul.f32 %v1761_v38, %v578_v36  ;;  %1318 = vlog2.f32 %v468_v58  ;;  %v769_v22 = vmul.f32 -0.5, %v2187_v28 }
  0xbf   : > { %v471_v21 = vmul.f32 -0.5, %v2205_v18  ;;  %v245_v48 = vmax.f32 %v2167_v51, 0.0  ;;  %1320 = vlog2.f32 %v766_v42  ;;  %v294_v12 = vsub.f32 0.0, %v270_v24 }
  0xc0   : > { %1011 = vst [vmem:[%s1967_s4 + $0x40] sm:$0xff] %v987_v52  ;;  %v1311_v50 = vpop.eup %1310  ;;  %v917_v30 = vadd.f32 %v893_v20, %v868_v15  ;;  %v464_v57 = vmul.f32 %v2170_v9, %v463_v25  ;;  %vm2231_vm10 = vcmp.lt.f32.partialorder %v465_v0, 0.0004427343  ;;  %v2236_v60 = vsub.f32 %v1691_v4, %v198_v61 }
  0xc1   : > { %v1313_v37 = vpop.eup %1312  ;;  %v988_v40 = vmul.f32 %v1311_v50, %v1764_v39  ;;  %v759_v1 = vmul.f32 0.6931472, %v1309_v5  ;;  %v333_v54 = vmul.f32 1.442695, %v294_v12  ;;  %v2241_v63 = vmul.f32 %v1697_v7, %v2040_v43  ;;  %v200_v50 = vld [vmem:[%s1679_s26 + $0x90] sm:$0xff] }
  0xc2   : > { %v952_v29 = vmul.f32 1.442695, %v917_v30  ;;  %v461_v59 = vmul.f32 0.6931472, %v1313_v37  ;;  %v756_v9 = vsel %vm2194_vm8, %v753_v46, %v750_v47  ;;  %v770_v53 = vadd.f32 1.0, %v769_v22 }
  0xc3   : > { %v2245_v17 = vpop.eup %1314  ;;  %1012 = vst [vmem:[%s1967_s4 + $0x48] sm:$0xff] %v988_v40  ;;  %v472_v27 = vadd.f32 1.0, %v471_v21  ;;  %1322 = vpow2.f32 %v333_v54  ;;  %v271_v16 = vand.u32 2147483647, %v2236_v60  ;;  %v607_v62 = vmul.f32 %v198_v61, %v198_v61 }
  0xc4   : > { %1324 = vpow2.f32 %v952_v29  ;;  %v467_v43 = vsel %vm2231_vm10, %v464_v57, %v461_v59  ;;  %v474_v3 = vand.u32 2147483647, %v2205_v18  ;;  %v477_v14 = vadd.f32 1.0, %v2245_v17 }
  0xc5   : > { %v579_v55 = vadd.f32 %v467_v43, %v243_v56  ;;  %v894_v35 = vmul.f32 %v1779_v49, %v756_v9  ;;  %v775_v44 = vadd.f32 1.0, %v2241_v63  ;;  %v295_v19 = vsub.f32 0.0, %v271_v16 }
  0xc6   : > { %v1317_v32 = vpop.eup %1316  ;;  %1326 = vlog2.f32 %v477_v14  ;;  %v480_v8 = vmul.f32 -0.5, %v2245_v17  ;;  %v772_v34 = vand.u32 2147483647, %v2187_v28  ;;  %v2261_v20 = vsub.f32 %v1691_v4, %v199_v31 }
  0xc7   : > { %v989_v23 = vmul.f32 %v1317_v32, %v1764_v39  ;;  %v869_v33 = vmul.f32 %v1761_v38, %v579_v55  ;;  %v473_v56 = vmul.f32 %v2205_v18, %v472_v27  ;;  %v2267_v11 = vmul.f32 %v1697_v7, %v607_v62 }
  0xc8   : > { %v1319_v0 = vpop.eup %1318  ;;  %vm2269_vm11 = vcmp.lt.f32.partialorder %v474_v3, 0.0004427343  ;;  %v765_v24 = vsel %vm2222_vm9, %v2218_v10, %v759_v1  ;;  %v771_v41 = vmul.f32 %v770_v53, %v2187_v28  ;;  %v335_v36 = vmul.f32 1.442695, %v295_v19 }
  0xc9   : > { %v1321_v25 = vpop.eup %1320  ;;  %1013 = vst [vmem:[%s1967_s4 + $0x50] sm:$0xff] %v989_v23  ;;  %v918_v58 = vadd.f32 %v894_v35, %v869_v33  ;;  %v470_v18 = vmul.f32 0.6931472, %v1319_v0  ;;  %1328 = vlog2.f32 %v775_v44  ;;  %v778_v52 = vmul.f32 -0.5, %v2241_v63 }
  0xca   : > { %v481_v47 = vadd.f32 1.0, %v480_v8  ;;  %1330 = vpow2.f32 %v335_v36  ;;  %v272_v46 = vand.u32 2147483647, %v2261_v20  ;;  %v608_v61 = vmul.f32 %v199_v31, %v199_v31 }
  0xcb   : > { %v954_v5 = vmul.f32 1.442695, %v918_v58  ;;  %v476_v10 = vsel %vm2269_vm11, %v473_v56, %v470_v18  ;;  %v895_v28 = vmul.f32 %v1779_v49, %v765_v24  ;;  %v784_v15 = vadd.f32 1.0, %v2267_v11  ;;  %v201_v56 = vld [vmem:[%s1679_s26 + $0x98] sm:$0xff] }
  0xcc   : > { %v580_v45 = vadd.f32 %v476_v10, %v244_v26  ;;  %v483_v22 = vand.u32 2147483647, %v2245_v17  ;;  %v768_v21 = vmul.f32 0.6931472, %v1321_v25  ;;  %v296_v12 = vsub.f32 0.0, %v272_v46 }
  0xcd   : > { %v2288_v30 = vpop.eup %1322  ;;  %1332 = vpow2.f32 %v954_v5  ;;  %vm2290_vm12 = vcmp.lt.f32.partialorder %v772_v34, 0.0004427343  ;;  %v779_v6 = vadd.f32 1.0, %v778_v52  ;;  %v781_v37 = vand.u32 2147483647, %v2241_v63 }
  0xce   : > { %v1325_v40 = vpop.eup %1324  ;;  %v870_v2 = vmul.f32 %v1761_v38, %v580_v45  ;;  %v482_v26 = vmul.f32 %v2245_v17, %v481_v47  ;;  %v486_v1 = vadd.f32 1.0, %v2288_v30  ;;  %v2299_v54 = vmul.f32 %v1697_v7, %v608_v61 }
  0xcf   : > { %v990_v29 = vmul.f32 %v1325_v40, %v1764_v39  ;;  %1334 = vlog2.f32 %v784_v15  ;;  %v337_v59 = vmul.f32 1.442695, %v296_v12  ;;  %v2303_v9 = vsub.f32 %v1691_v4, %v200_v50 }
  0xd0   : > { %v1327_v53 = vpop.eup %1326  ;;  %v919_v27 = vadd.f32 %v895_v28, %v870_v2  ;;  %vm2305_vm13 = vcmp.lt.f32.partialorder %v483_v22, 0.0004427343  ;;  %v774_v17 = vsel %vm2290_vm12, %v771_v41, %v768_v21  ;;  %1336 = vlog2.f32 %v486_v1 }
  0xd1   : > { %1014 = vst [vmem:[%s1967_s4 + $0x58] sm:$0xff] %v990_v29  ;;  %v479_v62 = vmul.f32 0.6931472, %v1327_v53  ;;  %v489_v31 = vmul.f32 -0.5, %v2288_v30  ;;  %v787_v43 = vmul.f32 -0.5, %v2267_v11  ;;  %1338 = vpow2.f32 %v337_v59 }
  0xd2   : > { %v956_v3 = vmul.f32 1.442695, %v919_v27  ;;  %v246_v14 = vmax.f32 %v2200_v13, 0.0  ;;  %v793_v55 = vadd.f32 1.0, %v2299_v54  ;;  %v780_v19 = vmul.f32 %v779_v6, %v2241_v63  ;;  %v202_v27 = vld [vmem:[%s1679_s26 + $0xa0] sm:$0xff] }
  0xd3   : > { %v1329_v35 = vpop.eup %1328  ;;  %v485_v44 = vsel %vm2305_vm13, %v482_v26, %v479_v62  ;;  %vm2319_vm14 = vcmp.lt.f32.partialorder %v781_v37, 0.0004427343  ;;  %v273_v8 = vand.u32 2147483647, %v2303_v9  ;;  %v896_v23 = vmul.f32 %v1779_v49, %v774_v17 }
  0xd4   : > { %v2324_v34 = vpop.eup %1330  ;;  %1340 = vpow2.f32 %v956_v3  ;;  %v581_v13 = vadd.f32 %v485_v44, %v245_v48  ;;  %v790_v33 = vand.u32 2147483647, %v2267_v11  ;;  %v490_v0 = vadd.f32 1.0, %v489_v31 }
  0xd5   : > { %v495_v63 = vadd.f32 1.0, %v2324_v34  ;;  %v788_v42 = vadd.f32 1.0, %v787_v43  ;;  %v609_v24 = vmul.f32 %v200_v50, %v200_v50  ;;  %v492_v36 = vand.u32 2147483647, %v2288_v30 }
  0xd6   : > { %v871_v41 = vmul.f32 %v1761_v38, %v581_v13  ;;  %1342 = vlog2.f32 %v793_v55  ;;  %v297_v25 = vsub.f32 0.0, %v273_v8  ;;  %v777_v51 = vmul.f32 0.6931472, %v1329_v35 }
  0xd7   : > { %v1333_v58 = vpop.eup %1332  ;;  %v247_v48 = vmax.f32 %v2236_v60, 0.0  ;;  %1344 = vlog2.f32 %v495_v63  ;;  %v2336_v18 = vsub.f32 %v1691_v4, %v201_v56  ;;  %v498_v46 = vmul.f32 -0.5, %v2324_v34 }
  0xd8   : > { %v991_v52 = vmul.f32 %v1333_v58, %v1764_v39  ;;  %v920_v47 = vadd.f32 %v896_v23, %v871_v41  ;;  %v339_v61 = vmul.f32 1.442695, %v297_v25  ;;  %v491_v10 = vmul.f32 %v2288_v30, %v490_v0  ;;  %v203_v25 = vld [vmem:[%s1679_s26 + $0xa8] sm:$0xff] }
  0xd9   : > { %v1335_v5 = vpop.eup %1334  ;;  %v789_v28 = vmul.f32 %v788_v42, %v2267_v11  ;;  %vm2342_vm15 = vcmp.lt.f32.partialorder %v790_v33, 0.0004427343  ;;  %v2347_v45 = vmul.f32 %v1697_v7, %v609_v24  ;;  %vm2350_vm0 = vcmp.lt.f32.partialorder %v492_v36, 0.0004427343 }
  0xda   : > { %v1337_v22 = vpop.eup %1336  ;;  %1015 = vst [vmem:[%s1967_s4 + $0x60] sm:$0xff] %v991_v52  ;;  %v958_v21 = vmul.f32 1.442695, %v920_v47  ;;  %v796_v50 = vmul.f32 -0.5, %v2299_v54  ;;  %1346 = vpow2.f32 %v339_v61  ;;  %v783_v57 = vsel %vm2319_vm14, %v780_v19, %v777_v51 }
  0xdb   : > { %v2355_v30 = vpop.eup %1338  ;;  %v488_v11 = vmul.f32 0.6931472, %v1337_v22  ;;  %v799_v6 = vand.u32 2147483647, %v2299_v54  ;;  %v274_v37 = vand.u32 2147483647, %v2336_v18  ;;  %v897_v62 = vmul.f32 %v1779_v49, %v783_v57 }
  0xdc   : > { %1348 = vpow2.f32 %v958_v21  ;;  %v499_v40 = vadd.f32 1.0, %v498_v46  ;;  %v786_v2 = vmul.f32 0.6931472, %v1335_v5  ;;  %v504_v26 = vadd.f32 1.0, %v2355_v30 }
  0xdd   : > { %v494_v1 = vsel %vm2350_vm0, %v491_v10, %v488_v11  ;;  %v501_v29 = vand.u32 2147483647, %v2324_v34  ;;  %v507_v59 = vmul.f32 -0.5, %v2355_v30  ;;  %v802_v53 = vadd.f32 1.0, %v2347_v45 }
  0xde   : > { %v1341_v16 = vpop.eup %1340  ;;  %v582_v17 = vadd.f32 %v494_v1, %v246_v14  ;;  %1350 = vlog2.f32 %v504_v26  ;;  %v797_v31 = vadd.f32 1.0, %v796_v50  ;;  %vm2370_vm1 = vcmp.lt.f32.partialorder %v799_v6, 0.0004427343 }
  0xdf   : > { %v992_v43 = vmul.f32 %v1341_v16, %v1764_v39  ;;  %v298_v55 = vsub.f32 0.0, %v274_v37  ;;  %v610_v35 = vmul.f32 %v201_v56, %v201_v56  ;;  %v500_v32 = vmul.f32 %v2324_v34, %v499_v40 }
  0xe0   : > { %v1343_v44 = vpop.eup %1342  ;;  %v872_v19 = vmul.f32 %v1761_v38, %v582_v17  ;;  %v792_v14 = vsel %vm2342_vm15, %v789_v28, %v786_v2  ;;  %v2379_v8 = vsub.f32 %v1691_v4, %v202_v27  ;;  %vm2382_vm2 = vcmp.lt.f32.partialorder %v501_v29, 0.0004427343 }
  0xe1   : > { %v1345_v13 = vpop.eup %1344  ;;  %1016 = vst [vmem:[%s1967_s4 + $0x68] sm:$0xff] %v992_v43  ;;  %v508_v33 = vadd.f32 1.0, %v507_v59  ;;  %1352 = vlog2.f32 %v802_v53  ;;  %v341_v56 = vmul.f32 1.442695, %v298_v55  ;;  %v2387_v34 = vmul.f32 %v1697_v7, %v610_v35  ;;  %v204_v35 = vld [vmem:[%s1679_s26 + $0xb0] sm:$0xff] }
  0xe2   : > { %v921_v0 = vadd.f32 %v897_v62, %v872_v19  ;;  %v497_v63 = vmul.f32 0.6931472, %v1345_v13  ;;  %v275_v42 = vand.u32 2147483647, %v2379_v8  ;;  %v898_v24 = vmul.f32 %v1779_v49, %v792_v14 }
  0xe3   : > { %v798_v41 = vmul.f32 %v797_v31, %v2299_v54  ;;  %v805_v36 = vmul.f32 -0.5, %v2347_v45  ;;  %1354 = vpow2.f32 %v341_v56  ;;  %v510_v47 = vand.u32 2147483647, %v2355_v30 }
  0xe4   : > { %v1347_v58 = vpop.eup %1346  ;;  %v960_v51 = vmul.f32 1.442695, %v921_v0  ;;  %v503_v52 = vsel %vm2382_vm2, %v500_v32, %v497_v63  ;;  %v795_v46 = vmul.f32 0.6931472, %v1343_v44  ;;  %v509_v5 = vmul.f32 %v2355_v30, %v508_v33 }
  0xe5   : > { %v583_v61 = vadd.f32 %v503_v52, %v247_v48  ;;  %v513_v10 = vadd.f32 1.0, %v1347_v58  ;;  %v611_v54 = vmul.f32 %v202_v27, %v202_v27  ;;  %v811_v15 = vadd.f32 1.0, %v2387_v34 }
  0xe6   : > { %v1349_v28 = vpop.eup %1348  ;;  %1356 = vpow2.f32 %v960_v51  ;;  %v299_v22 = vsub.f32 0.0, %v275_v42  ;;  %v2402_v21 = vsub.f32 %v1691_v4, %v203_v25  ;;  %v516_v60 = vmul.f32 -0.5, %v1347_v58 }
  0xe7   : > { %v993_v12 = vmul.f32 %v1349_v28, %v1764_v39  ;;  %v873_v50 = vmul.f32 %v1761_v38, %v583_v61  ;;  %1358 = vlog2.f32 %v513_v10  ;;  %v248_v30 = vmax.f32 %v2261_v20, 0.0 }
  0xe8   : > { %v1351_v48 = vpop.eup %1350  ;;  %vm2407_vm3 = vcmp.lt.f32.partialorder %v510_v47, 0.0004427343  ;;  %v806_v57 = vadd.f32 1.0, %v805_v36  ;;  %v801_v40 = vsel %vm2370_vm1, %v798_v41, %v795_v46  ;;  %v249_v2 = vmax.f32 %v2303_v9, 0.0 }
  0xe9   : > { %1017 = vst [vmem:[%s1967_s4 + $0x70] sm:$0xff] %v993_v12  ;;  %v922_v6 = vadd.f32 %v898_v24, %v873_v50  ;;  %v506_v37 = vmul.f32 0.6931472, %v1351_v48  ;;  %v808_v26 = vand.u32 2147483647, %v2347_v45  ;;  %1360 = vlog2.f32 %v811_v15 }
  0xea   : > { %v343_v1 = vmul.f32 1.442695, %v299_v22  ;;  %v2417_v20 = vmul.f32 %v1697_v7, %v611_v54  ;;  %v517_v27 = vadd.f32 1.0, %v516_v60  ;;  %v276_v16 = vand.u32 2147483647, %v2402_v21 }
  0xeb   : > { %v1353_v29 = vpop.eup %1352  ;;  %v962_v59 = vmul.f32 1.442695, %v922_v6  ;;  %v512_v53 = vsel %vm2407_vm3, %v509_v5, %v506_v37  ;;  %v899_v62 = vmul.f32 %v1779_v49, %v801_v40  ;;  %v807_v9 = vmul.f32 %v806_v57, %v2347_v45 }
  0xec   : > { %v584_v17 = vadd.f32 %v512_v53, %v248_v30  ;;  %1362 = vpow2.f32 %v343_v1  ;;  %v519_v43 = vand.u32 2147483647, %v1347_v58  ;;  %v300_v3 = vsub.f32 0.0, %v276_v16  ;;  %v205_v53 = vld [vmem:[%s1679_s26 + $0xb8] sm:$0xff] }
  0xed   : > { %v1355_v31 = vpop.eup %1354  ;;  %1364 = vpow2.f32 %v962_v59  ;;  %v612_v55 = vmul.f32 %v203_v25, %v203_v25  ;;  %v804_v19 = vmul.f32 0.6931472, %v1353_v29  ;;  %vm2426_vm4 = vcmp.lt.f32.partialorder %v808_v26, 0.0004427343 }
  0xee   : > { %v874_v44 = vmul.f32 %v1761_v38, %v584_v17  ;;  %v522_v14 = vadd.f32 1.0, %v1355_v31  ;;  %v518_v13 = vmul.f32 %v1347_v58, %v517_v27  ;;  %v814_v23 = vmul.f32 -0.5, %v2387_v34 }
  0xef   : > { %v820_v45 = vadd.f32 1.0, %v2417_v20  ;;  %v345_v33 = vmul.f32 1.442695, %v300_v3  ;;  %v2433_v63 = vmul.f32 %v1697_v7, %v612_v55  ;;  %v2436_v42 = vsub.f32 %v1691_v4, %v204_v35 }
  0xf0   : > { %v1357_v56 = vpop.eup %1356  ;;  %v923_v0 = vadd.f32 %v899_v62, %v874_v44  ;;  %1366 = vlog2.f32 %v522_v14  ;;  %vm520_vm5 = vcmp.lt.f32.partialorder %v519_v43, 0.0004427343  ;;  %v525_v36 = vmul.f32 -0.5, %v1355_v31 }
  0xf1   : > { %v1359_v24 = vpop.eup %1358  ;;  %v994_v41 = vmul.f32 %v1357_v56, %v1764_v39  ;;  %1368 = vpow2.f32 %v345_v33  ;;  %v810_v51 = vsel %vm2426_vm4, %v807_v9, %v804_v19  ;;  %v817_v52 = vand.u32 2147483647, %v2387_v34 }
  0xf2   : > { %v964_v25 = vmul.f32 1.442695, %v923_v0  ;;  %v515_v58 = vmul.f32 0.6931472, %v1359_v24  ;;  %v815_v47 = vadd.f32 1.0, %v814_v23  ;;  %1370 = vlog2.f32 %v820_v45 }
  0xf3   : > { %1018 = vst [vmem:[%s1967_s4 + $0x78] sm:$0xff] %v994_v41  ;;  %v1361_v46 = vpop.eup %1360  ;;  %v829_v5 = vadd.f32 1.0, %v2433_v63  ;;  %v277_v10 = vand.u32 2147483647, %v2436_v42  ;;  %v900_v28 = vmul.f32 %v1779_v49, %v810_v51  ;;  %v526_v15 = vadd.f32 1.0, %v525_v36 }
  0xf4   : > { %1372 = vpow2.f32 %v964_v25  ;;  %v521_v61 = vsel %vm520_vm5, %v518_v13, %v515_v58  ;;  %v613_v22 = vmul.f32 %v204_v35, %v204_v35  ;;  %v528_v50 = vand.u32 2147483647, %v1355_v31 }
  0xf5   : > { %v585_v54 = vadd.f32 %v521_v61, %v249_v2  ;;  %vm2446_vm6 = vcmp.lt.f32.partialorder %v817_v52, 0.0004427343  ;;  %v301_v48 = vsub.f32 0.0, %v277_v10  ;;  %v813_v57 = vmul.f32 0.6931472, %v1361_v46 }
  0xf6   : > { %v1363_v12 = vpop.eup %1362  ;;  %v816_v6 = vmul.f32 %v815_v47, %v2387_v34  ;;  %v823_v2 = vmul.f32 -0.5, %v2417_v20  ;;  %1374 = vlog2.f32 %v829_v5  ;;  %v527_v29 = vmul.f32 %v1355_v31, %v526_v15 }
  0xf7   : > { %v1365_v30 = vpop.eup %1364  ;;  %v875_v11 = vmul.f32 %v1761_v38, %v585_v54  ;;  %v531_v37 = vadd.f32 1.0, %v1363_v12  ;;  %v347_v26 = vmul.f32 1.442695, %v301_v48  ;;  %v2455_v59 = vmul.f32 %v1697_v7, %v613_v22 }
  0xf8   : > { %v995_v40 = vmul.f32 %v1365_v30, %v1764_v39  ;;  %v250_v16 = vmax.f32 %v2336_v18, 0.0  ;;  %vm2460_vm7 = vcmp.lt.f32.partialorder %v528_v50, 0.0004427343  ;;  %v534_v17 = vmul.f32 -0.5, %v1363_v12 }
  0xf9   : > { %v924_v1 = vadd.f32 %v900_v28, %v875_v11  ;;  %1376 = vlog2.f32 %v531_v37  ;;  %v819_v31 = vsel %vm2446_vm6, %v816_v6, %v813_v57  ;;  %v824_v3 = vadd.f32 1.0, %v823_v2 }
  0xfa   : > { %v1367_v27 = vpop.eup %1366  ;;  %1019 = vst [vmem:[%s1967_s4 + $0x80] sm:$0xff] %v995_v40  ;;  %1378 = vpow2.f32 %v347_v26  ;;  %v826_v55 = vand.u32 2147483647, %v2417_v20  ;;  %v2468_v44 = vsub.f32 %v1691_v4, %v205_v53  ;;  %v832_v32 = vmul.f32 -0.5, %v2433_v63 }
  0xfb   : > { %v1369_v62 = vpop.eup %1368  ;;  %v966_v9 = vmul.f32 1.442695, %v924_v1  ;;  %v524_v43 = vmul.f32 0.6931472, %v1367_v27  ;;  %v838_v14 = vadd.f32 1.0, %v2455_v59  ;;  %v901_v45 = vmul.f32 %v1779_v49, %v819_v31 }
  0xfc   : > { %v540_v35 = vadd.f32 1.0, %v1369_v62  ;;  %v1371_v18 = vpop.eup %1370  ;;  %v535_v33 = vadd.f32 1.0, %v534_v17  ;;  %v251_v4 = vmax.f32 %v2379_v8, 0.0  ;;  %v537_v0 = vand.u32 2147483647, %v1363_v12 }
  0xfd   : > { %1380 = vpow2.f32 %v966_v9  ;;  %v530_v19 = vsel %vm2460_vm7, %v527_v29, %v524_v43  ;;  %v543_v24 = vmul.f32 -0.5, %v1369_v62  ;;  %v822_v36 = vmul.f32 0.6931472, %v1371_v18 }
  0xfe   : > { %v1373_v13 = vpop.eup %1372  ;;  %v586_v23 = vadd.f32 %v530_v19, %v250_v16  ;;  %1382 = vlog2.f32 %v540_v35  ;;  %v825_v25 = vmul.f32 %v824_v3, %v2417_v20  ;;  %v278_v58 = vand.u32 2147483647, %v2468_v44 }
  0xff   : > { %v996_v56 = vmul.f32 %v1373_v13, %v1764_v39  ;;  %vm2481_vm8 = vcmp.lt.f32.partialorder %v826_v55, 0.0004427343  ;;  %v833_v52 = vadd.f32 1.0, %v832_v32  ;;  %v835_v47 = vand.u32 2147483647, %v2433_v63 }
 0x100   : > { %v876_v41 = vmul.f32 %v1761_v38, %v586_v23  ;;  %1384 = vlog2.f32 %v838_v14  ;;  %v1375_v46 = vpop.eup %1374  ;;  %v536_v61 = vmul.f32 %v1363_v12, %v535_v33  ;;  %v302_v5 = vsub.f32 0.0, %v278_v58 }
 0x101   : > { %1020 = vst [vmem:[%s1967_s4 + $0x88] sm:$0xff] %v996_v56  ;;  %v614_v10 = vmul.f32 %v205_v53, %v205_v53  ;;  %vm2486_vm9 = vcmp.lt.f32.partialorder %v537_v0, 0.0004427343  ;;  %v252_v20 = vmax.f32 %v2402_v21, 0.0  ;;  %v544_v15 = vadd.f32 1.0, %v543_v24 }
 0x102   : > { %v925_v8 = vadd.f32 %v901_v45, %v876_v41  ;;  %v546_v22 = vand.u32 2147483647, %v1369_v62  ;;  %v828_v30 = vsel %vm2481_vm8, %v825_v25, %v822_v36  ;;  %v349_v11 = vmul.f32 1.442695, %v302_v5 }
 0x103   : > { %v1377_v54 = vpop.eup %1376  ;;  %v831_v57 = vmul.f32 0.6931472, %v1375_v46  ;;  %v834_v12 = vmul.f32 %v833_v52, %v2433_v63  ;;  %vm2494_vm10 = vcmp.lt.f32.partialorder %v835_v47, 0.0004427343  ;;  %v841_v40 = vmul.f32 -0.5, %v2455_v59 }
 0x104   : > { %v1379_v50 = vpop.eup %1378  ;;  %v968_v60 = vmul.f32 1.442695, %v925_v8  ;;  %v533_v48 = vmul.f32 0.6931472, %v1377_v54  ;;  %v2502_v2 = vmul.f32 %v1697_v7, %v614_v10  ;;  %v902_v29 = vmul.f32 %v1779_v49, %v828_v30 }
 0x105   : > { %v549_v37 = vadd.f32 1.0, %v1379_v50  ;;  %v545_v63 = vmul.f32 %v1369_v62, %v544_v15  ;;  %vm547_vm11 = vcmp.lt.f32.partialorder %v546_v22, 0.0004427343  ;;  %v552_v16 = vmul.f32 -0.5, %v1379_v50 }
 0x106   : > { %1386 = vpow2.f32 %v968_v60  ;;  %v539_v21 = vsel %vm2486_vm9, %v536_v61, %v533_v48  ;;  %v837_v9 = vsel %vm2494_vm10, %v834_v12, %v831_v57  ;;  %v842_v7 = vadd.f32 1.0, %v841_v40 }
 0x107   : > { %v1381_v26 = vpop.eup %1380  ;;  %v587_v1 = vadd.f32 %v539_v21, %v251_v4  ;;  %1388 = vlog2.f32 %v549_v37  ;;  %v847_v43 = vadd.f32 1.0, %v2502_v2  ;;  %v844_v55 = vand.u32 2147483647, %v2455_v59 }
 0x108   : > { %v1383_v53 = vpop.eup %1382  ;;  %v997_v27 = vmul.f32 %v1381_v26, %v1764_v39  ;;  %1390 = vpow2.f32 %v349_v11  ;;  %v903_v18 = vmul.f32 %v1779_v49, %v837_v9  ;;  %v553_v19 = vadd.f32 1.0, %v552_v16 }
 0x109   : > { %v877_v34 = vmul.f32 %v1761_v38, %v587_v1  ;;  %v542_v17 = vmul.f32 0.6931472, %v1383_v53  ;;  %v555_v14 = vand.u32 2147483647, %v1379_v50  ;;  %v843_v45 = vmul.f32 %v842_v7, %v2455_v59 }
 0x10a   : > { %1021 = vst [vmem:[%s1967_s4 + $0x90] sm:$0xff] %v997_v27  ;;  %v1385_v31 = vpop.eup %1384  ;;  %1392 = vlog2.f32 %v847_v43  ;;  %vm2515_vm12 = vcmp.lt.f32.partialorder %v844_v55, 0.0004427343  ;;  %v554_v0 = vmul.f32 %v1379_v50, %v553_v19  ;;  %v253_v36 = vmax.f32 %v2436_v42, 0.0 }
 0x10b   : > { %v926_v3 = vadd.f32 %v902_v29, %v877_v34  ;;  %v548_v62 = vsel %vm547_vm11, %v545_v63, %v542_v17  ;;  %v840_v23 = vmul.f32 0.6931472, %v1385_v31  ;;  %vm556_vm13 = vcmp.lt.f32.partialorder %v555_v14, 0.0004427343 }
 0x10c   : > { %v588_v35 = vadd.f32 %v548_v62, %v252_v20  ;;  %v850_v46 = vmul.f32 -0.5, %v2502_v2  ;;  %v853_v15 = vand.u32 2147483647, %v2502_v2  ;;  %v254_v21 = vmax.f32 %v2468_v44, 0.0 }
 0x10d   : > { %v970_v32 = vmul.f32 1.442695, %v926_v3  ;;  %v846_v59 = vsel %vm2515_vm12, %v843_v45, %v840_v23 }
 0x10e   : > { %v878_v13 = vmul.f32 %v1761_v38, %v588_v35  ;;  %v904_v61 = vmul.f32 %v1779_v49, %v846_v59  ;;  %v851_v54 = vadd.f32 1.0, %v850_v46  ;;  %vm854_vm14 = vcmp.lt.f32.partialorder %v853_v15, 0.0004427343 }
 0x10f   : > { %1394 = vpow2.f32 %v970_v32 }
 0x110   : > { %v1387_v56 = vpop.eup %1386  ;;  %v927_v4 = vadd.f32 %v903_v18, %v878_v13  ;;  %v852_v11 = vmul.f32 %v851_v54, %v2502_v2 }
 0x111   : > { %v1389_v24 = vpop.eup %1388  ;;  %v998_v41 = vmul.f32 %v1387_v56, %v1764_v39 }
 0x112   : > { %v1391_v25 = vpop.eup %1390  ;;  %v972_v58 = vmul.f32 1.442695, %v927_v4  ;;  %v551_v51 = vmul.f32 0.6931472, %v1389_v24 }
 0x113   : > { %1022 = vst [vmem:[%s1967_s4 + $0x98] sm:$0xff] %v998_v41  ;;  %v558_v52 = vadd.f32 1.0, %v1391_v25  ;;  %v561_v5 = vmul.f32 -0.5, %v1391_v25  ;;  %v564_v48 = vand.u32 2147483647, %v1391_v25 }
 0x114   : > { %1396 = vpow2.f32 %v972_v58  ;;  %v557_v47 = vsel %vm556_vm13, %v554_v0, %v551_v51  ;;  %v1393_v10 = vpop.eup %1392 }
 0x115   : > { %v589_v8 = vadd.f32 %v557_v47, %v253_v36  ;;  %1398 = vlog2.f32 %v558_v52  ;;  %v562_v50 = vadd.f32 1.0, %v561_v5  ;;  %v849_v30 = vmul.f32 0.6931472, %v1393_v10 }
 0x116   : > { %vm565_vm15 = vcmp.lt.f32.partialorder %v564_v48, 0.0004427343 }
 0x117   : > { %v879_v42 = vmul.f32 %v1761_v38, %v589_v8  ;;  %v563_v12 = vmul.f32 %v1391_v25, %v562_v50  ;;  %v855_v26 = vsel %vm854_vm14, %v852_v11, %v849_v30 }
 0x118   : > { %v905_v2 = vmul.f32 %v1779_v49, %v855_v26 }
 0x119   : > { %v1395_v28 = vpop.eup %1394  ;;  %v928_v20 = vadd.f32 %v904_v61, %v879_v42 }
 0x11a   : > { %v999_v22 = vmul.f32 %v1395_v28, %v1764_v39 }
 0x11b   : > { %v974_v60 = vmul.f32 1.442695, %v928_v20 }
 0x11c   : > { %1023 = vst [vmem:[%s1967_s4 + $0xa0] sm:$0xff] %v999_v22 }
 0x11d   : > { %1400 = vpow2.f32 %v974_v60 }
 0x11e   : > { %v1397_v57 = vpop.eup %1396 }
 0x11f   : > { %v1399_v6 = vpop.eup %1398  ;;  %v1000_v37 = vmul.f32 %v1397_v57, %v1764_v39 }
 0x120   : > { %v560_v40 = vmul.f32 0.6931472, %v1399_v6 }
 0x121   : > { %1024 = vst [vmem:[%s1967_s4 + $0xa8] sm:$0xff] %v1000_v37 }
 0x122   : > { %v566_v1 = vsel %vm565_vm15, %v563_v12, %v560_v40 }
 0x123   : > { %v590_v29 = vadd.f32 %v566_v1, %v254_v21 }
 0x125   : > { %v880_v63 = vmul.f32 %v1761_v38, %v590_v29 }
 0x127   : > { %v1401_v53 = vpop.eup %1400  ;;  %v929_v27 = vadd.f32 %v905_v2, %v880_v63 }
 0x128   : > { %v1001_v16 = vmul.f32 %v1401_v53, %v1764_v39 }
 0x129   : > { %v976_v34 = vmul.f32 1.442695, %v929_v27 }
 0x12a   : > { %1025 = vst [vmem:[%s1967_s4 + $0xb0] sm:$0xff] %v1001_v16 }
 0x12b   : > { %1402 = vpow2.f32 %v976_v34 }
 0x135   : > { %v1403_v44 = vpop.eup %1402 }
 0x136   : > { %v1002_v38 = vmul.f32 %v1403_v44, %v1764_v39 }
 0x138   : > { %1026 = vst [vmem:[%s1967_s4 + $0xb8] sm:$0xff] %v1002_v38 }
 0x139   : > { %1460 = shalt.err (!%p1457_p0)
}
 0x13a   : > { %s1461_s3 = scalar_lea.hbm %s2543_s27, 3072  ;;  %s1465_s23 = scalar_lea.hbm %s2593_s2, 6144 }
 0x13b   : > { %p1462_p8 = scmp.ne.s32.totalorder %s2543_s27, %s1461_s3  ;;  %p1466_p1 = scmp.lt.u32.totalorder %s2543_s27, %s2593_s2 }
 0x13c   : > { %p1467_p2 = scmp.lt.u32.totalorder %s1465_s23, %s1461_s3  ;;  %p1469_p12 = scmp.lt.u32.totalorder %s1461_s3, %s2543_s27 }
 0x13d   : > { %p1463_p9 = pnand %p1462_p8, %p2693_p13 }
 0x13e   : > { %p1468_p11 = por %p1467_p2, %p1466_p1 }
 0x13f   : > { %p1464_p10 = pneg %p1463_p9 }
 0x140   : > { %p1470_p7 = por %p1469_p12, %p1468_p11 }
 0x142   : > { %p1471_p3 = pnand %p1470_p7, %p1464_p10 }
 0x144   : > { %1474 = shalt.err (!%p1471_p3)
}
 0x145   : > { %s1524_s30 = smov 1024   ;;  %s1525_s20 = smov 64  }
 0x146   : > { %1157 = dma.vmem_to_hbm [thread:$0]  (%p2693_p13), %s2545_s6, 3072, %s2543_s27, %s1028_s8, %s1524_s30, %s1524_s30, %s1525_s20  }
 0x147 PF: > { %s1057_s4 = sand.u32 1, %s1505_s9   ;;  %p2694_p6 = scmp.ne.s32.totalorder %s2600_s22, 0 }
 0x148   : > { %p2695_p4 = scmp.ge.s32.totalorder %s1517_s12, 2  ;;  %s1058_s5 = scalar_lea.sflag [#allocation4], %s1057_s4 }
 0x14a   : > { %p1168_p5 = pnand %p2695_p4, %p2694_p6 }
 0x14c   : > { %1500 = dma.done.wait (!%p1168_p5), %s1058_s5, 3072  }
 0x14d   : > { %1502 = vsyncadd (!%p1168_p5), %s1058_s5, 4294964224  ;;  %p16_p0 = scmp.ge.s32.totalorder %s1566_s15, 4   ;;  %s2696_s9 = smov %s1509_s10 }
 0x14e   : > { %s2697_s10 = smov %s1513_s11  ;;  %s2698_s11 = smov %s1578_s18 }
 0x14f   : > { %s2699_s12 = smov %s1566_s15  ;;  %18 = sbr.rel (!%p16_p0) target bundleno = 6 (0x6), region = 78 }
 0x156   :  { %1063 = vsyncpa [#allocation3], 1 }
 0x157   :  { %1065 = vsyncpa [#allocation3 + $0x1], 1 }
 0x158   :  { %1066 = vsyncpa [#allocation4], 1 }
 0x159   :  { %1068 = vsyncpa [#allocation4 + $0x1], 1 }
 0x15a   :  { %1069 = vsyncpa [#allocation5], 1 }
 0x15b   :  { %1071 = vsyncpa [#allocation5 + $0x1], 1 }

</bundles_post_ra>
